<compile_context>
chip_gen: v5e
topology: v5e:2x2
jax: 0.10.0
libtpu: 0.0.40
codegen_flags: <defaults>
</compile_context>

<pallas_src>
import functools
import math

import jax
import jax.numpy as jnp
from jax.experimental import pallas as pl
from jax.experimental.pallas import tpu as pltpu

_MIB = 1024 * 1024


def _round_up(x, m):
    return -(-x // m) * m


def _device_kind():
    try:
        return jax.devices()[0].device_kind.lower()
    except Exception:
        return ""


def _vmem_capacity_bytes(kind):
    try:
        info = pltpu.get_tpu_info()
        cap = getattr(info, "vmem_capacity_bytes", None)
        if cap:
            return int(cap)
    except Exception:
        pass
    # v7x has 64 MiB physical VMEM per TensorCore; v5e/v6e have 128 MiB.
    return (64 if "v7" in kind else 128) * _MIB


def _estimate_vmem_bytes(T, C, TQ, TK, H, D, mm_dtype, io_dtype):
    """Conservative VMEM budget: double-buffered pipeline blocks + persistent
    K/V scratch + the dominant in-kernel temporaries of one grid step."""
    mmb = jnp.dtype(mm_dtype).itemsize
    iob = jnp.dtype(io_dtype).itemsize
    Cp, Dp = _round_up(C, 128), _round_up(D, 128)
    Tp, TQp, TKp = _round_up(T, 8), _round_up(TQ, 8), _round_up(TK, 128)
    x_blk = 2 * Tp * Cp * iob                                     # x block (x2 buffers)
    o_blk = 2 * TQp * Cp * iob                                    # out block
    w_blk = 2 * H * (3 * Cp * Dp + _round_up(D, 8) * Cp) * mmb    # Wq/Wk/Wv + Wp
    kv_scr = 2 * H * Tp * Dp * mmb                                # K and V scratch
    tmp = (4 * TQp * TKp * 4                                      # s / p / exp temps
           + TQp * Cp * (iob + mmb + 8)                           # x tile + out acc
           + 6 * TQp * Dp * 4)                                    # q / acc / pv / y
    return x_blk + o_blk + w_blk + kv_scr + tmp


def _pick_tiles(T, C, H, D, mm_dtype, io_dtype, tq_cands, tk_cands, vmem_budget):
    for tq in tq_cands:
        for tk in tk_cands:
            if _estimate_vmem_bytes(T, C, tq, tk, H, D, mm_dtype, io_dtype) <= vmem_budget:
                return tq, tk
    return min(tq_cands), min(tk_cands)


def _self_attention_kernel(x_ref, wq_ref, bq_ref, wk_ref, bk_ref, wv_ref, bv_ref,
                           wp_ref, bp_ref, o_ref, k_s, v_s, *,
                           n_head, head_dim, q_scale, tile_q, tile_k,
                           num_kv_blocks, mm_dtype, exp_dtype, approx_reciprocal):
    """grid = (batch, query-tile). One step produces one (TQ, C) output tile."""
    qi = pl.program_id(1)
    H, D, TQ, TK = n_head, head_dim, tile_q, tile_k

    # ---- K / V projection, once per batch element --------------------------
    # Weights are pre-split per head (H, C, D) in the wrapper, so each head
    # writes a full (T, D) slab -> no lane-masked D-wide slicing / relayouts.
    @pl.when(qi == 0)
    def _project_kv():
        x_all = x_ref[0].astype(mm_dtype)                          # (T, C)
        for h in range(H):                                         # static unroll
            k_s[h] = (jnp.dot(x_all, wk_ref[h],
                              preferred_element_type=jnp.float32)
                      + bk_ref[h]).astype(mm_dtype)                # (T, D)
            v_s[h] = (jnp.dot(x_all, wv_ref[h],
                              preferred_element_type=jnp.float32)
                      + bv_ref[h]).astype(mm_dtype)

    # ---- Q projected for this tile only (no full-sequence Q scratch) -------
    q_start = pl.multiple_of(qi * TQ, TQ)
    x_tile = x_ref[0, pl.ds(q_start, TQ), :].astype(mm_dtype)      # (TQ, C)

    out_acc = None
    for h in range(H):                                             # static unroll
        # 1/sqrt(D) folded into Q: O(TQ*D) work instead of O(TQ*T).
        q_h = ((jnp.dot(x_tile, wq_ref[h], preferred_element_type=jnp.float32)
                + bq_ref[h]) * q_scale).astype(mm_dtype)           # (TQ, D)

        # ---- flash-style online softmax over KV blocks ----------------------
        def kv_block(kv_i, carry, _q=q_h, _h=h):
            m_prev, l_prev, acc_prev = carry
            k_start = pl.multiple_of(kv_i * TK, TK)
            k_blk = k_s[_h, pl.ds(k_start, TK), :]                 # (TK, D)
            v_blk = v_s[_h, pl.ds(k_start, TK), :]                 # (TK, D)
            # 'qd,kd->qk' contraction (Mosaic handles the K transpose).
            s = jax.lax.dot_general(
                _q, k_blk, dimension_numbers=(((1,), (1,)), ((), ())),
                preferred_element_type=jnp.float32)                # (TQ, TK) f32
            m_cur = jnp.max(s, axis=-1, keepdims=True)
            m_new = jnp.maximum(m_prev, m_cur)
            alpha = jnp.exp(m_prev - m_new)                        # (TQ, 1) f32
            # bf16 exp on v6e/v7x -> EUP at bf16 rate, result already in
            # matmul dtype (no separate cast pass); f32 on v5e.
            p = jnp.exp((s - m_new).astype(exp_dtype))
            l_new = alpha * l_prev + jnp.sum(p, axis=-1, keepdims=True,
                                             dtype=jnp.float32)
            pv = jnp.dot(p.astype(mm_dtype), v_blk,
                         preferred_element_type=jnp.float32)       # (TQ, D) f32
            return m_new, l_new, alpha * acc_prev + pv

        carry0 = (jnp.full((TQ, 1), -jnp.inf, jnp.float32),
                  jnp.zeros((TQ, 1), jnp.float32),
                  jnp.zeros((TQ, D), jnp.float32))
        if num_kv_blocks <= 4:                                     # short: unroll
            carry = carry0
            for i in range(num_kv_blocks):
                carry = kv_block(i, carry)
        else:
            carry = jax.lax.fori_loop(0, num_kv_blocks, kv_block, carry0)
        _, l_f, acc_f = carry

        # Deferred softmax normalization on the EUP.
        y_h = (acc_f * pl.reciprocal(l_f, approx=approx_reciprocal)).astype(mm_dtype)

        # Output projection accumulated per head -> no merged-head scratch.
        contrib = jnp.dot(y_h, wp_ref[h], preferred_element_type=jnp.float32)
        out_acc = contrib if out_acc is None else out_acc + contrib

    # attn_drop / resid_drop: identity in eval mode.
    o_ref[0] = (out_acc + bp_ref[...]).astype(o_ref.dtype)


def _build_call(B, T, C, TQ, TK, n_head, mm_dtype, exp_dtype, io_dtype,
                approx_reciprocal, vmem_limit_bytes):
    D = C // n_head
    nq = T // TQ
    nk = T // TK

    kernel = functools.partial(
        _self_attention_kernel,
        n_head=n_head, head_dim=D, q_scale=1.0 / math.sqrt(D),
        tile_q=TQ, tile_k=TK, num_kv_blocks=nk,
        mm_dtype=mm_dtype, exp_dtype=exp_dtype,
        approx_reciprocal=approx_reciprocal)

    grid_spec = pltpu.PrefetchScalarGridSpec(
        num_scalar_prefetch=0,
        grid=(B, nq),
        in_specs=[
            # x: full sequence; block index changes only with b, so Pallas
            # DMAs it once per batch element and reuses it across query tiles.
            pl.BlockSpec((1, T, C), lambda b, i: (b, 0, 0)),
            pl.BlockSpec((n_head, C, D), lambda b, i: (0, 0, 0)),  # W_q per head
            pl.BlockSpec((n_head, 1, D), lambda b, i: (0, 0, 0)),  # b_q
            pl.BlockSpec((n_head, C, D), lambda b, i: (0, 0, 0)),  # W_k
            pl.BlockSpec((n_head, 1, D), lambda b, i: (0, 0, 0)),  # b_k
            pl.BlockSpec((n_head, C, D), lambda b, i: (0, 0, 0)),  # W_v
            pl.BlockSpec((n_head, 1, D), lambda b, i: (0, 0, 0)),  # b_v
            pl.BlockSpec((n_head, D, C), lambda b, i: (0, 0, 0)),  # W_proj per head
            pl.BlockSpec((1, C), lambda b, i: (0, 0)),             # b_proj
        ],
        out_specs=pl.BlockSpec((1, TQ, C), lambda b, i: (b, i, 0)),
        scratch_shapes=[
            pltpu.VMEM((n_head, T, D), mm_dtype),                  # K scratch
            pltpu.VMEM((n_head, T, D), mm_dtype),                  # V scratch
        ],
    )

    return pl.pallas_call(
        kernel,
        out_shape=jax.ShapeDtypeStruct((B, T, C), io_dtype),
        grid_spec=grid_spec,
        compiler_params=pltpu.CompilerParams(
            # Batch axis is independent (megacore parallel); the query-tile
            # axis carries the per-batch K/V scratch -> "arbitrary".
            # TODO(synk): on v7x with B == 1, hoist K/V projection into its own
            # pallas_call so both axes can be "parallel" across the 2 TCs.
            dimension_semantics=("parallel", "arbitrary"),
            vmem_limit_bytes=int(vmem_limit_bytes),
        ),
    )


def prepare_params(params, n_head, *, matmul_dtype=jnp.bfloat16):
    """One-time weight packing/cast (do this OUTSIDE the per-step jit).
    Input weights are stored (in, out) so y = x @ W + b (== PyTorch x @ W.T + b).
    Q/K/V weights are split per head into (H, C, D); proj into (H, D, C)."""
    C = params["wq"].shape[0]
    assert C % n_head == 0
    D = C // n_head
    mm = jnp.dtype(matmul_dtype)

    def per_head_w(w):      # (C, C) -> (H, C, D): head h uses output cols [h*D, (h+1)*D)
        return jnp.transpose(w.reshape(C, n_head, D), (1, 0, 2)).astype(mm)

    def per_head_b(b):      # (1, C) -> (H, 1, D)
        return jnp.transpose(jnp.asarray(b).reshape(1, n_head, D), (1, 0, 2)).astype(jnp.float32)

    return {
        "wq": per_head_w(params["wq"]), "bq": per_head_b(params["bq"]),
        "wk": per_head_w(params["wk"]), "bk": per_head_b(params["bk"]),
        "wv": per_head_w(params["wv"]), "bv": per_head_b(params["bv"]),
        "wp": params["wp"].astype(mm).reshape(n_head, D, C),     # input rows split per head
        "bp": jnp.asarray(params["bp"]).reshape(1, C).astype(jnp.float32),
    }


def self_attention(x, prepared, n_head, *, matmul_dtype=jnp.bfloat16,
                   approx_reciprocal=True):
    """x: (B, T, C) in its original dtype (the matmul-dtype cast happens inside
    the kernel, avoiding an extra HBM round trip).  `prepared` = prepare_params(...)."""
    B, T, C = x.shape
    assert C % n_head == 0
    D = C // n_head
    mm_dtype = jnp.dtype(matmul_dtype)

    kind = _device_kind()
    exp_dtype = (jnp.bfloat16
                 if mm_dtype == jnp.dtype(jnp.bfloat16) and ("v6" in kind or "v7" in kind)
                 else jnp.float32)

    usable_vmem = _vmem_capacity_bytes(kind) - 8 * _MIB

    # Generation-aware query tile: 256 considered on v6e (256x256 MXU, 128 MiB
    # VMEM); 128 elsewhere; fall back to full T when it does not tile evenly.
    tq_prefs = [256, 128] if "v6" in kind else [128]
    tq_cands = [t for t in tq_prefs if T % t == 0]
    if T not in tq_cands:
        tq_cands.append(T)
    tk_cands = [t for t in (512, 256, 128) if T % t == 0]
    if T not in tk_cands:
        tk_cands.append(T)

    TQ, TK = _pick_tiles(T, C, n_head, D, mm_dtype, x.dtype, tq_cands, tk_cands,
                         usable_vmem)
    budget = _estimate_vmem_bytes(T, C, TQ, TK, n_head, D, mm_dtype, x.dtype)
    if budget > usable_vmem:
        raise ValueError(
            f"SelfAttention kernel needs ~{budget >> 20} MiB VMEM even at the "
            f"smallest tiles; only ~{usable_vmem >> 20} MiB is available.")

    call = _build_call(B, T, C, TQ, TK, n_head, mm_dtype, exp_dtype, x.dtype,
                       approx_reciprocal, usable_vmem)
    return call(x, prepared["wq"], prepared["bq"], prepared["wk"], prepared["bk"],
                prepared["wv"], prepared["bv"], prepared["wp"], prepared["bp"])


def _reference(x, params, n_head):
    """Plain-JAX reference mirroring the PyTorch forward (eval mode, no mask)."""
    B, T, C = x.shape
    D = C // n_head

    def lin(t, w, b):
        return t @ w + b   # w is (in, out), b is (1, C)

    q = lin(x, params["wq"], params["bq"]).reshape(B, T, n_head, D).transpose(0, 2, 1, 3)
    k = lin(x, params["wk"], params["bk"]).reshape(B, T, n_head, D).transpose(0, 2, 1, 3)
    v = lin(x, params["wv"], params["bv"]).reshape(B, T, n_head, D).transpose(0, 2, 1, 3)
    att = jnp.einsum("bhqd,bhkd->bhqk", q, k) * (1.0 / math.sqrt(D))
    att = jax.nn.softmax(att, axis=-1)
    y = jnp.einsum("bhqk,bhkd->bhqd", att, v)
    y = y.transpose(0, 2, 1, 3).reshape(B, T, C)
    return lin(y, params["wp"], params["bp"])


def _make_params(key, C):
    ks = jax.random.split(key, 8)
    scale = 1.0 / math.sqrt(C)
    return {
        "wq": jax.random.normal(ks[0], (C, C), jnp.float32) * scale,
        "wk": jax.random.normal(ks[1], (C, C), jnp.float32) * scale,
        "wv": jax.random.normal(ks[2], (C, C), jnp.float32) * scale,
        "wp": jax.random.normal(ks[3], (C, C), jnp.float32) * scale,
        "bq": jax.random.normal(ks[4], (1, C), jnp.float32) * 0.1,
        "bk": jax.random.normal(ks[5], (1, C), jnp.float32) * 0.1,
        "bv": jax.random.normal(ks[6], (1, C), jnp.float32) * 0.1,
        "bp": jax.random.normal(ks[7], (1, C), jnp.float32) * 0.1,
    }


def _run_case(name, key, B, T, C, n_head, matmul_dtype, approx_reciprocal, atol, rtol):
    kp, kx = jax.random.split(key)
    params = _make_params(kp, C)
    x = jax.random.normal(kx, (B, T, C), jnp.float32)
    ref = _reference(x, params, n_head)
    prepared = prepare_params(params, n_head, matmul_dtype=matmul_dtype)
    out = self_attention(x, prepared, n_head, matmul_dtype=matmul_dtype,
                         approx_reciprocal=approx_reciprocal)
    out = jax.block_until_ready(out)
    assert out.shape == (B, T, C)
    err = float(jnp.max(jnp.abs(out - ref)))
    assert jnp.allclose(out, ref, atol=atol, rtol=rtol), \
        f"{name}: max abs diff {err}"


if __name__ == "__main__":
    key = jax.random.PRNGKey(0)
    k_small, k_med = jax.random.split(key)

    # Small shape (single tile / single KV block), exact f32 math.
    _run_case("small-f32", k_small, B=2, T=8, C=32, n_head=4,
              matmul_dtype=jnp.float32, approx_reciprocal=False,
              atol=1e-4, rtol=1e-4)

    # Medium shape: multiple query tiles and KV blocks -> exercises the
    # online-softmax tiling, per-tile Q projection and per-head projection.
    _run_case("medium-f32", k_med, B=2, T=384, C=256, n_head=4,
              matmul_dtype=jnp.float32, approx_reciprocal=False,
              atol=2e-3, rtol=2e-3)
    _run_case("medium-bf16", k_med, B=2, T=384, C=256, n_head=4,
              matmul_dtype=jnp.bfloat16, approx_reciprocal=True,
              atol=5e-2, rtol=5e-2)

    print("KERNEL_OK")
</pallas_src>

<mosaic_0001>
module attributes {stable_mosaic.version = 11 : i64} {
  func.func @_self_attention_kernel(%arg0: i32, %arg1: i32, %arg2: memref<1x8x32xf32, #tpu.memory_space<vmem>>, %arg3: memref<4x32x8xf32, #tpu.memory_space<vmem>>, %arg4: memref<4x1x8xf32, #tpu.memory_space<vmem>>, %arg5: memref<4x32x8xf32, #tpu.memory_space<vmem>>, %arg6: memref<4x1x8xf32, #tpu.memory_space<vmem>>, %arg7: memref<4x32x8xf32, #tpu.memory_space<vmem>>, %arg8: memref<4x1x8xf32, #tpu.memory_space<vmem>>, %arg9: memref<4x8x32xf32, #tpu.memory_space<vmem>>, %arg10: memref<1x32xf32, #tpu.memory_space<vmem>>, %arg11: memref<1x8x32xf32, #tpu.memory_space<vmem>>, %arg12: memref<4x8x8xf32, #tpu.memory_space<vmem>>, %arg13: memref<4x8x8xf32, #tpu.memory_space<vmem>>) attributes {dimension_semantics = [#tpu.dimension_semantics<parallel>, #tpu.dimension_semantics<arbitrary>], iteration_bounds = array<i64: 2, 1>, scalar_prefetch = 0 : i64, scratch_operands = 2 : i64, tpu.core_type = #tpu.core_type<tc>, window_params = [{transform_indices = @transform_0, window_bounds = array<i64: 1, 8, 32>}, {pipeline_mode = #tpu.pipeline_mode<synchronous>, transform_indices = @transform_1, window_bounds = array<i64: 4, 32, 8>}, {pipeline_mode = #tpu.pipeline_mode<synchronous>, transform_indices = @transform_2, window_bounds = array<i64: 4, 1, 8>}, {pipeline_mode = #tpu.pipeline_mode<synchronous>, transform_indices = @transform_3, window_bounds = array<i64: 4, 32, 8>}, {pipeline_mode = #tpu.pipeline_mode<synchronous>, transform_indices = @transform_4, window_bounds = array<i64: 4, 1, 8>}, {pipeline_mode = #tpu.pipeline_mode<synchronous>, transform_indices = @transform_5, window_bounds = array<i64: 4, 32, 8>}, {pipeline_mode = #tpu.pipeline_mode<synchronous>, transform_indices = @transform_6, window_bounds = array<i64: 4, 1, 8>}, {pipeline_mode = #tpu.pipeline_mode<synchronous>, transform_indices = @transform_7, window_bounds = array<i64: 4, 8, 32>}, {pipeline_mode = #tpu.pipeline_mode<synchronous>, transform_indices = @transform_8, window_bounds = array<i64: 1, 32>}, {transform_indices = @transform_9, window_bounds = array<i64: 1, 8, 32>}]} {
    %c0_i32 = arith.constant 0 : i32
    %0 = arith.cmpi eq, %arg1, %c0_i32 : i32
    %1 = arith.extui %0 : i1 to i32
    %c0_i32_0 = arith.constant 0 : i32
    %2 = arith.cmpi ne, %1, %c0_i32_0 : i32
    scf.if %2 {
      %c0_99 = arith.constant 0 : index
      %c0_100 = arith.constant 0 : index
      %c0_101 = arith.constant 0 : index
      %185 = vector.load %arg2[%c0_99, %c0_100, %c0_101] : memref<1x8x32xf32, #tpu.memory_space<vmem>>, vector<1x8x32xf32>
      %186 = vector.shape_cast %185 : vector<1x8x32xf32> to vector<8x32xf32>
      %c0_102 = arith.constant 0 : index
      %c0_103 = arith.constant 0 : index
      %c0_104 = arith.constant 0 : index
      %187 = vector.load %arg5[%c0_102, %c0_103, %c0_104] : memref<4x32x8xf32, #tpu.memory_space<vmem>>, vector<1x32x8xf32>
      %188 = vector.shape_cast %187 : vector<1x32x8xf32> to vector<32x8xf32>
      %cst_105 = arith.constant dense<0.000000e+00> : vector<8x8xf32>
      %189 = tpu.matmul %186, %188, %cst_105 {dimension_numbers = #tpu.dot_dimension_numbers<[1], [0], [0], [1], [0, 0, 1, 1], [], []>} : vector<8x32xf32>, vector<32x8xf32>, vector<8x8xf32> -> vector<8x8xf32>
      %c0_106 = arith.constant 0 : index
      %c0_107 = arith.constant 0 : index
      %c0_108 = arith.constant 0 : index
      %190 = vector.load %arg6[%c0_106, %c0_107, %c0_108] : memref<4x1x8xf32, #tpu.memory_space<vmem>>, vector<1x1x8xf32>
      %191 = vector.shape_cast %190 : vector<1x1x8xf32> to vector<1x8xf32>
      %192 = vector.broadcast %191 : vector<1x8xf32> to vector<8x8xf32>
      %193 = arith.addf %189, %192 : vector<8x8xf32>
      %c0_109 = arith.constant 0 : index
      %c0_110 = arith.constant 0 : index
      %c0_111 = arith.constant 0 : index
      %194 = vector.load %arg12[%c0_109, %c0_110, %c0_111] : memref<4x8x8xf32, #tpu.memory_space<vmem>>, vector<1x8x8xf32>
      %195 = vector.shape_cast %194 : vector<1x8x8xf32> to vector<8x8xf32>
      %196 = vector.shape_cast %193 : vector<8x8xf32> to vector<1x8x8xf32>
      tpu.vector_store %arg12[%c0_109, %c0_110, %c0_111], %196 {strides = array<i32>} : memref<4x8x8xf32, #tpu.memory_space<vmem>>, vector<1x8x8xf32>,
      %c0_112 = arith.constant 0 : index
      %c0_113 = arith.constant 0 : index
      %c0_114 = arith.constant 0 : index
      %197 = vector.load %arg7[%c0_112, %c0_113, %c0_114] : memref<4x32x8xf32, #tpu.memory_space<vmem>>, vector<1x32x8xf32>
      %198 = vector.shape_cast %197 : vector<1x32x8xf32> to vector<32x8xf32>
      %cst_115 = arith.constant dense<0.000000e+00> : vector<8x8xf32>
      %199 = tpu.matmul %186, %198, %cst_115 {dimension_numbers = #tpu.dot_dimension_numbers<[1], [0], [0], [1], [0, 0, 1, 1], [], []>} : vector<8x32xf32>, vector<32x8xf32>, vector<8x8xf32> -> vector<8x8xf32>
      %c0_116 = arith.constant 0 : index
      %c0_117 = arith.constant 0 : index
      %c0_118 = arith.constant 0 : index
      %200 = vector.load %arg8[%c0_116, %c0_117, %c0_118] : memref<4x1x8xf32, #tpu.memory_space<vmem>>, vector<1x1x8xf32>
      %201 = vector.shape_cast %200 : vector<1x1x8xf32> to vector<1x8xf32>
      %202 = vector.broadcast %201 : vector<1x8xf32> to vector<8x8xf32>
      %203 = arith.addf %199, %202 : vector<8x8xf32>
      %c0_119 = arith.constant 0 : index
      %c0_120 = arith.constant 0 : index
      %c0_121 = arith.constant 0 : index
      %204 = vector.load %arg13[%c0_119, %c0_120, %c0_121] : memref<4x8x8xf32, #tpu.memory_space<vmem>>, vector<1x8x8xf32>
      %205 = vector.shape_cast %204 : vector<1x8x8xf32> to vector<8x8xf32>
      %206 = vector.shape_cast %203 : vector<8x8xf32> to vector<1x8x8xf32>
      tpu.vector_store %arg13[%c0_119, %c0_120, %c0_121], %206 {strides = array<i32>} : memref<4x8x8xf32, #tpu.memory_space<vmem>>, vector<1x8x8xf32>,
      %c1_122 = arith.constant 1 : index
      %c0_123 = arith.constant 0 : index
      %c0_124 = arith.constant 0 : index
      %207 = vector.load %arg5[%c1_122, %c0_123, %c0_124] : memref<4x32x8xf32, #tpu.memory_space<vmem>>, vector<1x32x8xf32>
      %208 = vector.shape_cast %207 : vector<1x32x8xf32> to vector<32x8xf32>
      %cst_125 = arith.constant dense<0.000000e+00> : vector<8x8xf32>
      %209 = tpu.matmul %186, %208, %cst_125 {dimension_numbers = #tpu.dot_dimension_numbers<[1], [0], [0], [1], [0, 0, 1, 1], [], []>} : vector<8x32xf32>, vector<32x8xf32>, vector<8x8xf32> -> vector<8x8xf32>
      %c1_126 = arith.constant 1 : index
      %c0_127 = arith.constant 0 : index
      %c0_128 = arith.constant 0 : index
      %210 = vector.load %arg6[%c1_126, %c0_127, %c0_128] : memref<4x1x8xf32, #tpu.memory_space<vmem>>, vector<1x1x8xf32>
      %211 = vector.shape_cast %210 : vector<1x1x8xf32> to vector<1x8xf32>
      %212 = vector.broadcast %211 : vector<1x8xf32> to vector<8x8xf32>
      %213 = arith.addf %209, %212 : vector<8x8xf32>
      %c1_129 = arith.constant 1 : index
      %c0_130 = arith.constant 0 : index
      %c0_131 = arith.constant 0 : index
      %214 = vector.load %arg12[%c1_129, %c0_130, %c0_131] : memref<4x8x8xf32, #tpu.memory_space<vmem>>, vector<1x8x8xf32>
      %215 = vector.shape_cast %214 : vector<1x8x8xf32> to vector<8x8xf32>
      %216 = vector.shape_cast %213 : vector<8x8xf32> to vector<1x8x8xf32>
      tpu.vector_store %arg12[%c1_129, %c0_130, %c0_131], %216 {strides = array<i32>} : memref<4x8x8xf32, #tpu.memory_space<vmem>>, vector<1x8x8xf32>,
      %c1_132 = arith.constant 1 : index
      %c0_133 = arith.constant 0 : index
      %c0_134 = arith.constant 0 : index
      %217 = vector.load %arg7[%c1_132, %c0_133, %c0_134] : memref<4x32x8xf32, #tpu.memory_space<vmem>>, vector<1x32x8xf32>
      %218 = vector.shape_cast %217 : vector<1x32x8xf32> to vector<32x8xf32>
      %cst_135 = arith.constant dense<0.000000e+00> : vector<8x8xf32>
      %219 = tpu.matmul %186, %218, %cst_135 {dimension_numbers = #tpu.dot_dimension_numbers<[1], [0], [0], [1], [0, 0, 1, 1], [], []>} : vector<8x32xf32>, vector<32x8xf32>, vector<8x8xf32> -> vector<8x8xf32>
      %c1_136 = arith.constant 1 : index
      %c0_137 = arith.constant 0 : index
      %c0_138 = arith.constant 0 : index
      %220 = vector.load %arg8[%c1_136, %c0_137, %c0_138] : memref<4x1x8xf32, #tpu.memory_space<vmem>>, vector<1x1x8xf32>
      %221 = vector.shape_cast %220 : vector<1x1x8xf32> to vector<1x8xf32>
      %222 = vector.broadcast %221 : vector<1x8xf32> to vector<8x8xf32>
      %223 = arith.addf %219, %222 : vector<8x8xf32>
      %c1_139 = arith.constant 1 : index
      %c0_140 = arith.constant 0 : index
      %c0_141 = arith.constant 0 : index
      %224 = vector.load %arg13[%c1_139, %c0_140, %c0_141] : memref<4x8x8xf32, #tpu.memory_space<vmem>>, vector<1x8x8xf32>
      %225 = vector.shape_cast %224 : vector<1x8x8xf32> to vector<8x8xf32>
      %226 = vector.shape_cast %223 : vector<8x8xf32> to vector<1x8x8xf32>
      tpu.vector_store %arg13[%c1_139, %c0_140, %c0_141], %226 {strides = array<i32>} : memref<4x8x8xf32, #tpu.memory_space<vmem>>, vector<1x8x8xf32>,
      %c2_142 = arith.constant 2 : index
      %c0_143 = arith.constant 0 : index
      %c0_144 = arith.constant 0 : index
      %227 = vector.load %arg5[%c2_142, %c0_143, %c0_144] : memref<4x32x8xf32, #tpu.memory_space<vmem>>, vector<1x32x8xf32>
      %228 = vector.shape_cast %227 : vector<1x32x8xf32> to vector<32x8xf32>
      %cst_145 = arith.constant dense<0.000000e+00> : vector<8x8xf32>
      %229 = tpu.matmul %186, %228, %cst_145 {dimension_numbers = #tpu.dot_dimension_numbers<[1], [0], [0], [1], [0, 0, 1, 1], [], []>} : vector<8x32xf32>, vector<32x8xf32>, vector<8x8xf32> -> vector<8x8xf32>
      %c2_146 = arith.constant 2 : index
      %c0_147 = arith.constant 0 : index
      %c0_148 = arith.constant 0 : index
      %230 = vector.load %arg6[%c2_146, %c0_147, %c0_148] : memref<4x1x8xf32, #tpu.memory_space<vmem>>, vector<1x1x8xf32>
      %231 = vector.shape_cast %230 : vector<1x1x8xf32> to vector<1x8xf32>
      %232 = vector.broadcast %231 : vector<1x8xf32> to vector<8x8xf32>
      %233 = arith.addf %229, %232 : vector<8x8xf32>
      %c2_149 = arith.constant 2 : index
      %c0_150 = arith.constant 0 : index
      %c0_151 = arith.constant 0 : index
      %234 = vector.load %arg12[%c2_149, %c0_150, %c0_151] : memref<4x8x8xf32, #tpu.memory_space<vmem>>, vector<1x8x8xf32>
      %235 = vector.shape_cast %234 : vector<1x8x8xf32> to vector<8x8xf32>
      %236 = vector.shape_cast %233 : vector<8x8xf32> to vector<1x8x8xf32>
      tpu.vector_store %arg12[%c2_149, %c0_150, %c0_151], %236 {strides = array<i32>} : memref<4x8x8xf32, #tpu.memory_space<vmem>>, vector<1x8x8xf32>,
      %c2_152 = arith.constant 2 : index
      %c0_153 = arith.constant 0 : index
      %c0_154 = arith.constant 0 : index
      %237 = vector.load %arg7[%c2_152, %c0_153, %c0_154] : memref<4x32x8xf32, #tpu.memory_space<vmem>>, vector<1x32x8xf32>
      %238 = vector.shape_cast %237 : vector<1x32x8xf32> to vector<32x8xf32>
      %cst_155 = arith.constant dense<0.000000e+00> : vector<8x8xf32>
      %239 = tpu.matmul %186, %238, %cst_155 {dimension_numbers = #tpu.dot_dimension_numbers<[1], [0], [0], [1], [0, 0, 1, 1], [], []>} : vector<8x32xf32>, vector<32x8xf32>, vector<8x8xf32> -> vector<8x8xf32>
      %c2_156 = arith.constant 2 : index
      %c0_157 = arith.constant 0 : index
      %c0_158 = arith.constant 0 : index
      %240 = vector.load %arg8[%c2_156, %c0_157, %c0_158] : memref<4x1x8xf32, #tpu.memory_space<vmem>>, vector<1x1x8xf32>
      %241 = vector.shape_cast %240 : vector<1x1x8xf32> to vector<1x8xf32>
      %242 = vector.broadcast %241 : vector<1x8xf32> to vector<8x8xf32>
      %243 = arith.addf %239, %242 : vector<8x8xf32>
      %c2_159 = arith.constant 2 : index
      %c0_160 = arith.constant 0 : index
      %c0_161 = arith.constant 0 : index
      %244 = vector.load %arg13[%c2_159, %c0_160, %c0_161] : memref<4x8x8xf32, #tpu.memory_space<vmem>>, vector<1x8x8xf32>
      %245 = vector.shape_cast %244 : vector<1x8x8xf32> to vector<8x8xf32>
      %246 = vector.shape_cast %243 : vector<8x8xf32> to vector<1x8x8xf32>
      tpu.vector_store %arg13[%c2_159, %c0_160, %c0_161], %246 {strides = array<i32>} : memref<4x8x8xf32, #tpu.memory_space<vmem>>, vector<1x8x8xf32>,
      %c3_162 = arith.constant 3 : index
      %c0_163 = arith.constant 0 : index
      %c0_164 = arith.constant 0 : index
      %247 = vector.load %arg5[%c3_162, %c0_163, %c0_164] : memref<4x32x8xf32, #tpu.memory_space<vmem>>, vector<1x32x8xf32>
      %248 = vector.shape_cast %247 : vector<1x32x8xf32> to vector<32x8xf32>
      %cst_165 = arith.constant dense<0.000000e+00> : vector<8x8xf32>
      %249 = tpu.matmul %186, %248, %cst_165 {dimension_numbers = #tpu.dot_dimension_numbers<[1], [0], [0], [1], [0, 0, 1, 1], [], []>} : vector<8x32xf32>, vector<32x8xf32>, vector<8x8xf32> -> vector<8x8xf32>
      %c3_166 = arith.constant 3 : index
      %c0_167 = arith.constant 0 : index
      %c0_168 = arith.constant 0 : index
      %250 = vector.load %arg6[%c3_166, %c0_167, %c0_168] : memref<4x1x8xf32, #tpu.memory_space<vmem>>, vector<1x1x8xf32>
      %251 = vector.shape_cast %250 : vector<1x1x8xf32> to vector<1x8xf32>
      %252 = vector.broadcast %251 : vector<1x8xf32> to vector<8x8xf32>
      %253 = arith.addf %249, %252 : vector<8x8xf32>
      %c3_169 = arith.constant 3 : index
      %c0_170 = arith.constant 0 : index
      %c0_171 = arith.constant 0 : index
      %254 = vector.load %arg12[%c3_169, %c0_170, %c0_171] : memref<4x8x8xf32, #tpu.memory_space<vmem>>, vector<1x8x8xf32>
      %255 = vector.shape_cast %254 : vector<1x8x8xf32> to vector<8x8xf32>
      %256 = vector.shape_cast %253 : vector<8x8xf32> to vector<1x8x8xf32>
      tpu.vector_store %arg12[%c3_169, %c0_170, %c0_171], %256 {strides = array<i32>} : memref<4x8x8xf32, #tpu.memory_space<vmem>>, vector<1x8x8xf32>,
      %c3_172 = arith.constant 3 : index
      %c0_173 = arith.constant 0 : index
      %c0_174 = arith.constant 0 : index
      %257 = vector.load %arg7[%c3_172, %c0_173, %c0_174] : memref<4x32x8xf32, #tpu.memory_space<vmem>>, vector<1x32x8xf32>
      %258 = vector.shape_cast %257 : vector<1x32x8xf32> to vector<32x8xf32>
      %cst_175 = arith.constant dense<0.000000e+00> : vector<8x8xf32>
      %259 = tpu.matmul %186, %258, %cst_175 {dimension_numbers = #tpu.dot_dimension_numbers<[1], [0], [0], [1], [0, 0, 1, 1], [], []>} : vector<8x32xf32>, vector<32x8xf32>, vector<8x8xf32> -> vector<8x8xf32>
      %c3_176 = arith.constant 3 : index
      %c0_177 = arith.constant 0 : index
      %c0_178 = arith.constant 0 : index
      %260 = vector.load %arg8[%c3_176, %c0_177, %c0_178] : memref<4x1x8xf32, #tpu.memory_space<vmem>>, vector<1x1x8xf32>
      %261 = vector.shape_cast %260 : vector<1x1x8xf32> to vector<1x8xf32>
      %262 = vector.broadcast %261 : vector<1x8xf32> to vector<8x8xf32>
      %263 = arith.addf %259, %262 : vector<8x8xf32>
      %c3_179 = arith.constant 3 : index
      %c0_180 = arith.constant 0 : index
      %c0_181 = arith.constant 0 : index
      %264 = vector.load %arg13[%c3_179, %c0_180, %c0_181] : memref<4x8x8xf32, #tpu.memory_space<vmem>>, vector<1x8x8xf32>
      %265 = vector.shape_cast %264 : vector<1x8x8xf32> to vector<8x8xf32>
      %266 = vector.shape_cast %263 : vector<8x8xf32> to vector<1x8x8xf32>
      tpu.vector_store %arg13[%c3_179, %c0_180, %c0_181], %266 {strides = array<i32>} : memref<4x8x8xf32, #tpu.memory_space<vmem>>, vector<1x8x8xf32>,
    } else {
    }
    %c8_i32 = arith.constant 8 : i32
    %3 = arith.muli %arg1, %c8_i32 : i32
    %4 = tpu.assume_multiple %3, 8 : i32
    %c0 = arith.constant 0 : index
    %5 = arith.index_cast %4 : i32 to index
    %c0_1 = arith.constant 0 : index
    %6 = vector.load %arg2[%c0, %5, %c0_1] : memref<1x8x32xf32, #tpu.memory_space<vmem>>, vector<1x8x32xf32>
    %7 = vector.shape_cast %6 : vector<1x8x32xf32> to vector<8x32xf32>
    %c0_2 = arith.constant 0 : index
    %c0_3 = arith.constant 0 : index
    %c0_4 = arith.constant 0 : index
    %8 = vector.load %arg3[%c0_2, %c0_3, %c0_4] : memref<4x32x8xf32, #tpu.memory_space<vmem>>, vector<1x32x8xf32>
    %9 = vector.shape_cast %8 : vector<1x32x8xf32> to vector<32x8xf32>
    %cst = arith.constant dense<0.000000e+00> : vector<8x8xf32>
    %10 = tpu.matmul %7, %9, %cst {dimension_numbers = #tpu.dot_dimension_numbers<[1], [0], [0], [1], [0, 0, 1, 1], [], []>} : vector<8x32xf32>, vector<32x8xf32>, vector<8x8xf32> -> vector<8x8xf32>
    %c0_5 = arith.constant 0 : index
    %c0_6 = arith.constant 0 : index
    %c0_7 = arith.constant 0 : index
    %11 = vector.load %arg4[%c0_5, %c0_6, %c0_7] : memref<4x1x8xf32, #tpu.memory_space<vmem>>, vector<1x1x8xf32>
    %12 = vector.shape_cast %11 : vector<1x1x8xf32> to vector<1x8xf32>
    %13 = vector.broadcast %12 : vector<1x8xf32> to vector<8x8xf32>
    %14 = arith.addf %10, %13 : vector<8x8xf32>
    %cst_8 = arith.constant 0.353553385 : f32
    %15 = vector.broadcast %cst_8 : f32 to vector<8x8xf32>
    %16 = arith.mulf %14, %15 : vector<8x8xf32>
    %cst_9 = arith.constant 0xFF800000 : f32
    %17 = vector.broadcast %cst_9 : f32 to vector<8x1xf32>
    %cst_10 = arith.constant 0.000000e+00 : f32
    %18 = vector.broadcast %cst_10 : f32 to vector<8x1xf32>
    %cst_11 = arith.constant 0.000000e+00 : f32
    %19 = vector.broadcast %cst_11 : f32 to vector<8x8xf32>
    %c0_i32_12 = arith.constant 0 : i32
    %20 = tpu.assume_multiple %c0_i32_12, 8 : i32
    %c0_13 = arith.constant 0 : index
    %21 = arith.index_cast %20 : i32 to index
    %c0_14 = arith.constant 0 : index
    %22 = vector.load %arg12[%c0_13, %21, %c0_14] : memref<4x8x8xf32, #tpu.memory_space<vmem>>, vector<1x8x8xf32>
    %23 = vector.shape_cast %22 : vector<1x8x8xf32> to vector<8x8xf32>
    %c0_15 = arith.constant 0 : index
    %24 = arith.index_cast %20 : i32 to index
    %c0_16 = arith.constant 0 : index
    %25 = vector.load %arg13[%c0_15, %24, %c0_16] : memref<4x8x8xf32, #tpu.memory_space<vmem>>, vector<1x8x8xf32>
    %26 = vector.shape_cast %25 : vector<1x8x8xf32> to vector<8x8xf32>
    %cst_17 = arith.constant dense<0.000000e+00> : vector<8x8xf32>
    %27 = tpu.matmul %16, %23, %cst_17 {dimension_numbers = #tpu.dot_dimension_numbers<[1], [1], [0], [0], [0, 0, 1, 0], [], []>} : vector<8x8xf32>, vector<8x8xf32>, vector<8x8xf32> -> vector<8x8xf32>
    %cst_18 = arith.constant dense<0xFF800000> : vector<8xf32>
    %28 = vector.multi_reduction <maximumf>, %27, %cst_18 [1] : vector<8x8xf32> to vector<8xf32>
    %29 = vector.shape_cast %28 : vector<8xf32> to vector<8x1xf32>
    %30 = arith.maximumf %17, %29 : vector<8x1xf32>
    %31 = arith.subf %17, %30 : vector<8x1xf32>
    %32 = math.exp %31 : vector<8x1xf32>
    %33 = vector.broadcast %30 : vector<8x1xf32> to vector<8x8xf32>
    %34 = arith.subf %27, %33 : vector<8x8xf32>
    %35 = math.exp %34 : vector<8x8xf32>
    %36 = arith.mulf %32, %18 : vector<8x1xf32>
    %cst_19 = arith.constant dense<0.000000e+00> : vector<8xf32>
    %37 = vector.multi_reduction <add>, %35, %cst_19 [1] : vector<8x8xf32> to vector<8xf32>
    %38 = vector.shape_cast %37 : vector<8xf32> to vector<8x1xf32>
    %39 = arith.addf %36, %38 : vector<8x1xf32>
    %cst_20 = arith.constant dense<0.000000e+00> : vector<8x8xf32>
    %40 = tpu.matmul %35, %26, %cst_20 {dimension_numbers = #tpu.dot_dimension_numbers<[1], [0], [0], [1], [0, 0, 1, 1], [], []>} : vector<8x8xf32>, vector<8x8xf32>, vector<8x8xf32> -> vector<8x8xf32>
    %41 = vector.broadcast %32 : vector<8x1xf32> to vector<8x8xf32>
    %42 = arith.mulf %41, %19 : vector<8x8xf32>
    %43 = arith.addf %42, %40 : vector<8x8xf32>
    %44 = tpu.reciprocal %39 : vector<8x1xf32> -> vector<8x1xf32>
    %45 = vector.broadcast %44 : vector<8x1xf32> to vector<8x8xf32>
    %46 = arith.mulf %43, %45 : vector<8x8xf32>
    %c0_21 = arith.constant 0 : index
    %c0_22 = arith.constant 0 : index
    %c0_23 = arith.constant 0 : index
    %47 = vector.load %arg9[%c0_21, %c0_22, %c0_23] : memref<4x8x32xf32, #tpu.memory_space<vmem>>, vector<1x8x32xf32>
    %48 = vector.shape_cast %47 : vector<1x8x32xf32> to vector<8x32xf32>
    %cst_24 = arith.constant dense<0.000000e+00> : vector<8x32xf32>
    %49 = tpu.matmul %46, %48, %cst_24 {dimension_numbers = #tpu.dot_dimension_numbers<[1], [0], [0], [1], [0, 0, 1, 1], [], []>} : vector<8x8xf32>, vector<8x32xf32>, vector<8x32xf32> -> vector<8x32xf32>
    %c1 = arith.constant 1 : index
    %c0_25 = arith.constant 0 : index
    %c0_26 = arith.constant 0 : index
    %50 = vector.load %arg3[%c1, %c0_25, %c0_26] : memref<4x32x8xf32, #tpu.memory_space<vmem>>, vector<1x32x8xf32>
    %51 = vector.shape_cast %50 : vector<1x32x8xf32> to vector<32x8xf32>
    %cst_27 = arith.constant dense<0.000000e+00> : vector<8x8xf32>
    %52 = tpu.matmul %7, %51, %cst_27 {dimension_numbers = #tpu.dot_dimension_numbers<[1], [0], [0], [1], [0, 0, 1, 1], [], []>} : vector<8x32xf32>, vector<32x8xf32>, vector<8x8xf32> -> vector<8x8xf32>
    %c1_28 = arith.constant 1 : index
    %c0_29 = arith.constant 0 : index
    %c0_30 = arith.constant 0 : index
    %53 = vector.load %arg4[%c1_28, %c0_29, %c0_30] : memref<4x1x8xf32, #tpu.memory_space<vmem>>, vector<1x1x8xf32>
    %54 = vector.shape_cast %53 : vector<1x1x8xf32> to vector<1x8xf32>
    %55 = vector.broadcast %54 : vector<1x8xf32> to vector<8x8xf32>
    %56 = arith.addf %52, %55 : vector<8x8xf32>
    %cst_31 = arith.constant 0.353553385 : f32
    %57 = vector.broadcast %cst_31 : f32 to vector<8x8xf32>
    %58 = arith.mulf %56, %57 : vector<8x8xf32>
    %cst_32 = arith.constant 0xFF800000 : f32
    %59 = vector.broadcast %cst_32 : f32 to vector<8x1xf32>
    %cst_33 = arith.constant 0.000000e+00 : f32
    %60 = vector.broadcast %cst_33 : f32 to vector<8x1xf32>
    %cst_34 = arith.constant 0.000000e+00 : f32
    %61 = vector.broadcast %cst_34 : f32 to vector<8x8xf32>
    %c0_i32_35 = arith.constant 0 : i32
    %62 = tpu.assume_multiple %c0_i32_35, 8 : i32
    %c1_36 = arith.constant 1 : index
    %63 = arith.index_cast %62 : i32 to index
    %c0_37 = arith.constant 0 : index
    %64 = vector.load %arg12[%c1_36, %63, %c0_37] : memref<4x8x8xf32, #tpu.memory_space<vmem>>, vector<1x8x8xf32>
    %65 = vector.shape_cast %64 : vector<1x8x8xf32> to vector<8x8xf32>
    %c1_38 = arith.constant 1 : index
    %66 = arith.index_cast %62 : i32 to index
    %c0_39 = arith.constant 0 : index
    %67 = vector.load %arg13[%c1_38, %66, %c0_39] : memref<4x8x8xf32, #tpu.memory_space<vmem>>, vector<1x8x8xf32>
    %68 = vector.shape_cast %67 : vector<1x8x8xf32> to vector<8x8xf32>
    %cst_40 = arith.constant dense<0.000000e+00> : vector<8x8xf32>
    %69 = tpu.matmul %58, %65, %cst_40 {dimension_numbers = #tpu.dot_dimension_numbers<[1], [1], [0], [0], [0, 0, 1, 0], [], []>} : vector<8x8xf32>, vector<8x8xf32>, vector<8x8xf32> -> vector<8x8xf32>
    %cst_41 = arith.constant dense<0xFF800000> : vector<8xf32>
    %70 = vector.multi_reduction <maximumf>, %69, %cst_41 [1] : vector<8x8xf32> to vector<8xf32>
    %71 = vector.shape_cast %70 : vector<8xf32> to vector<8x1xf32>
    %72 = arith.maximumf %59, %71 : vector<8x1xf32>
    %73 = arith.subf %59, %72 : vector<8x1xf32>
    %74 = math.exp %73 : vector<8x1xf32>
    %75 = vector.broadcast %72 : vector<8x1xf32> to vector<8x8xf32>
    %76 = arith.subf %69, %75 : vector<8x8xf32>
    %77 = math.exp %76 : vector<8x8xf32>
    %78 = arith.mulf %74, %60 : vector<8x1xf32>
    %cst_42 = arith.constant dense<0.000000e+00> : vector<8xf32>
    %79 = vector.multi_reduction <add>, %77, %cst_42 [1] : vector<8x8xf32> to vector<8xf32>
    %80 = vector.shape_cast %79 : vector<8xf32> to vector<8x1xf32>
    %81 = arith.addf %78, %80 : vector<8x1xf32>
    %cst_43 = arith.constant dense<0.000000e+00> : vector<8x8xf32>
    %82 = tpu.matmul %77, %68, %cst_43 {dimension_numbers = #tpu.dot_dimension_numbers<[1], [0], [0], [1], [0, 0, 1, 1], [], []>} : vector<8x8xf32>, vector<8x8xf32>, vector<8x8xf32> -> vector<8x8xf32>
    %83 = vector.broadcast %74 : vector<8x1xf32> to vector<8x8xf32>
    %84 = arith.mulf %83, %61 : vector<8x8xf32>
    %85 = arith.addf %84, %82 : vector<8x8xf32>
    %86 = tpu.reciprocal %81 : vector<8x1xf32> -> vector<8x1xf32>
    %87 = vector.broadcast %86 : vector<8x1xf32> to vector<8x8xf32>
    %88 = arith.mulf %85, %87 : vector<8x8xf32>
    %c1_44 = arith.constant 1 : index
    %c0_45 = arith.constant 0 : index
    %c0_46 = arith.constant 0 : index
    %89 = vector.load %arg9[%c1_44, %c0_45, %c0_46] : memref<4x8x32xf32, #tpu.memory_space<vmem>>, vector<1x8x32xf32>
    %90 = vector.shape_cast %89 : vector<1x8x32xf32> to vector<8x32xf32>
    %cst_47 = arith.constant dense<0.000000e+00> : vector<8x32xf32>
    %91 = tpu.matmul %88, %90, %cst_47 {dimension_numbers = #tpu.dot_dimension_numbers<[1], [0], [0], [1], [0, 0, 1, 1], [], []>} : vector<8x8xf32>, vector<8x32xf32>, vector<8x32xf32> -> vector<8x32xf32>
    %92 = arith.addf %49, %91 : vector<8x32xf32>
    %c2 = arith.constant 2 : index
    %c0_48 = arith.constant 0 : index
    %c0_49 = arith.constant 0 : index
    %93 = vector.load %arg3[%c2, %c0_48, %c0_49] : memref<4x32x8xf32, #tpu.memory_space<vmem>>, vector<1x32x8xf32>
    %94 = vector.shape_cast %93 : vector<1x32x8xf32> to vector<32x8xf32>
    %cst_50 = arith.constant dense<0.000000e+00> : vector<8x8xf32>
    %95 = tpu.matmul %7, %94, %cst_50 {dimension_numbers = #tpu.dot_dimension_numbers<[1], [0], [0], [1], [0, 0, 1, 1], [], []>} : vector<8x32xf32>, vector<32x8xf32>, vector<8x8xf32> -> vector<8x8xf32>
    %c2_51 = arith.constant 2 : index
    %c0_52 = arith.constant 0 : index
    %c0_53 = arith.constant 0 : index
    %96 = vector.load %arg4[%c2_51, %c0_52, %c0_53] : memref<4x1x8xf32, #tpu.memory_space<vmem>>, vector<1x1x8xf32>
    %97 = vector.shape_cast %96 : vector<1x1x8xf32> to vector<1x8xf32>
    %98 = vector.broadcast %97 : vector<1x8xf32> to vector<8x8xf32>
    %99 = arith.addf %95, %98 : vector<8x8xf32>
    %cst_54 = arith.constant 0.353553385 : f32
    %100 = vector.broadcast %cst_54 : f32 to vector<8x8xf32>
    %101 = arith.mulf %99, %100 : vector<8x8xf32>
    %cst_55 = arith.constant 0xFF800000 : f32
    %102 = vector.broadcast %cst_55 : f32 to vector<8x1xf32>
    %cst_56 = arith.constant 0.000000e+00 : f32
    %103 = vector.broadcast %cst_56 : f32 to vector<8x1xf32>
    %cst_57 = arith.constant 0.000000e+00 : f32
    %104 = vector.broadcast %cst_57 : f32 to vector<8x8xf32>
    %c0_i32_58 = arith.constant 0 : i32
    %105 = tpu.assume_multiple %c0_i32_58, 8 : i32
    %c2_59 = arith.constant 2 : index
    %106 = arith.index_cast %105 : i32 to index
    %c0_60 = arith.constant 0 : index
    %107 = vector.load %arg12[%c2_59, %106, %c0_60] : memref<4x8x8xf32, #tpu.memory_space<vmem>>, vector<1x8x8xf32>
    %108 = vector.shape_cast %107 : vector<1x8x8xf32> to vector<8x8xf32>
    %c2_61 = arith.constant 2 : index
    %109 = arith.index_cast %105 : i32 to index
    %c0_62 = arith.constant 0 : index
    %110 = vector.load %arg13[%c2_61, %109, %c0_62] : memref<4x8x8xf32, #tpu.memory_space<vmem>>, vector<1x8x8xf32>
    %111 = vector.shape_cast %110 : vector<1x8x8xf32> to vector<8x8xf32>
    %cst_63 = arith.constant dense<0.000000e+00> : vector<8x8xf32>
    %112 = tpu.matmul %101, %108, %cst_63 {dimension_numbers = #tpu.dot_dimension_numbers<[1], [1], [0], [0], [0, 0, 1, 0], [], []>} : vector<8x8xf32>, vector<8x8xf32>, vector<8x8xf32> -> vector<8x8xf32>
    %cst_64 = arith.constant dense<0xFF800000> : vector<8xf32>
    %113 = vector.multi_reduction <maximumf>, %112, %cst_64 [1] : vector<8x8xf32> to vector<8xf32>
    %114 = vector.shape_cast %113 : vector<8xf32> to vector<8x1xf32>
    %115 = arith.maximumf %102, %114 : vector<8x1xf32>
    %116 = arith.subf %102, %115 : vector<8x1xf32>
    %117 = math.exp %116 : vector<8x1xf32>
    %118 = vector.broadcast %115 : vector<8x1xf32> to vector<8x8xf32>
    %119 = arith.subf %112, %118 : vector<8x8xf32>
    %120 = math.exp %119 : vector<8x8xf32>
    %121 = arith.mulf %117, %103 : vector<8x1xf32>
    %cst_65 = arith.constant dense<0.000000e+00> : vector<8xf32>
    %122 = vector.multi_reduction <add>, %120, %cst_65 [1] : vector<8x8xf32> to vector<8xf32>
    %123 = vector.shape_cast %122 : vector<8xf32> to vector<8x1xf32>
    %124 = arith.addf %121, %123 : vector<8x1xf32>
    %cst_66 = arith.constant dense<0.000000e+00> : vector<8x8xf32>
    %125 = tpu.matmul %120, %111, %cst_66 {dimension_numbers = #tpu.dot_dimension_numbers<[1], [0], [0], [1], [0, 0, 1, 1], [], []>} : vector<8x8xf32>, vector<8x8xf32>, vector<8x8xf32> -> vector<8x8xf32>
    %126 = vector.broadcast %117 : vector<8x1xf32> to vector<8x8xf32>
    %127 = arith.mulf %126, %104 : vector<8x8xf32>
    %128 = arith.addf %127, %125 : vector<8x8xf32>
    %129 = tpu.reciprocal %124 : vector<8x1xf32> -> vector<8x1xf32>
    %130 = vector.broadcast %129 : vector<8x1xf32> to vector<8x8xf32>
    %131 = arith.mulf %128, %130 : vector<8x8xf32>
    %c2_67 = arith.constant 2 : index
    %c0_68 = arith.constant 0 : index
    %c0_69 = arith.constant 0 : index
    %132 = vector.load %arg9[%c2_67, %c0_68, %c0_69] : memref<4x8x32xf32, #tpu.memory_space<vmem>>, vector<1x8x32xf32>
    %133 = vector.shape_cast %132 : vector<1x8x32xf32> to vector<8x32xf32>
    %cst_70 = arith.constant dense<0.000000e+00> : vector<8x32xf32>
    %134 = tpu.matmul %131, %133, %cst_70 {dimension_numbers = #tpu.dot_dimension_numbers<[1], [0], [0], [1], [0, 0, 1, 1], [], []>} : vector<8x8xf32>, vector<8x32xf32>, vector<8x32xf32> -> vector<8x32xf32>
    %135 = arith.addf %92, %134 : vector<8x32xf32>
    %c3 = arith.constant 3 : index
    %c0_71 = arith.constant 0 : index
    %c0_72 = arith.constant 0 : index
    %136 = vector.load %arg3[%c3, %c0_71, %c0_72] : memref<4x32x8xf32, #tpu.memory_space<vmem>>, vector<1x32x8xf32>
    %137 = vector.shape_cast %136 : vector<1x32x8xf32> to vector<32x8xf32>
    %cst_73 = arith.constant dense<0.000000e+00> : vector<8x8xf32>
    %138 = tpu.matmul %7, %137, %cst_73 {dimension_numbers = #tpu.dot_dimension_numbers<[1], [0], [0], [1], [0, 0, 1, 1], [], []>} : vector<8x32xf32>, vector<32x8xf32>, vector<8x8xf32> -> vector<8x8xf32>
    %c3_74 = arith.constant 3 : index
    %c0_75 = arith.constant 0 : index
    %c0_76 = arith.constant 0 : index
    %139 = vector.load %arg4[%c3_74, %c0_75, %c0_76] : memref<4x1x8xf32, #tpu.memory_space<vmem>>, vector<1x1x8xf32>
    %140 = vector.shape_cast %139 : vector<1x1x8xf32> to vector<1x8xf32>
    %141 = vector.broadcast %140 : vector<1x8xf32> to vector<8x8xf32>
    %142 = arith.addf %138, %141 : vector<8x8xf32>
    %cst_77 = arith.constant 0.353553385 : f32
    %143 = vector.broadcast %cst_77 : f32 to vector<8x8xf32>
    %144 = arith.mulf %142, %143 : vector<8x8xf32>
    %cst_78 = arith.constant 0xFF800000 : f32
    %145 = vector.broadcast %cst_78 : f32 to vector<8x1xf32>
    %cst_79 = arith.constant 0.000000e+00 : f32
    %146 = vector.broadcast %cst_79 : f32 to vector<8x1xf32>
    %cst_80 = arith.constant 0.000000e+00 : f32
    %147 = vector.broadcast %cst_80 : f32 to vector<8x8xf32>
    %c0_i32_81 = arith.constant 0 : i32
    %148 = tpu.assume_multiple %c0_i32_81, 8 : i32
    %c3_82 = arith.constant 3 : index
    %149 = arith.index_cast %148 : i32 to index
    %c0_83 = arith.constant 0 : index
    %150 = vector.load %arg12[%c3_82, %149, %c0_83] : memref<4x8x8xf32, #tpu.memory_space<vmem>>, vector<1x8x8xf32>
    %151 = vector.shape_cast %150 : vector<1x8x8xf32> to vector<8x8xf32>
    %c3_84 = arith.constant 3 : index
    %152 = arith.index_cast %148 : i32 to index
    %c0_85 = arith.constant 0 : index
    %153 = vector.load %arg13[%c3_84, %152, %c0_85] : memref<4x8x8xf32, #tpu.memory_space<vmem>>, vector<1x8x8xf32>
    %154 = vector.shape_cast %153 : vector<1x8x8xf32> to vector<8x8xf32>
    %cst_86 = arith.constant dense<0.000000e+00> : vector<8x8xf32>
    %155 = tpu.matmul %144, %151, %cst_86 {dimension_numbers = #tpu.dot_dimension_numbers<[1], [1], [0], [0], [0, 0, 1, 0], [], []>} : vector<8x8xf32>, vector<8x8xf32>, vector<8x8xf32> -> vector<8x8xf32>
    %cst_87 = arith.constant dense<0xFF800000> : vector<8xf32>
    %156 = vector.multi_reduction <maximumf>, %155, %cst_87 [1] : vector<8x8xf32> to vector<8xf32>
    %157 = vector.shape_cast %156 : vector<8xf32> to vector<8x1xf32>
    %158 = arith.maximumf %145, %157 : vector<8x1xf32>
    %159 = arith.subf %145, %158 : vector<8x1xf32>
    %160 = math.exp %159 : vector<8x1xf32>
    %161 = vector.broadcast %158 : vector<8x1xf32> to vector<8x8xf32>
    %162 = arith.subf %155, %161 : vector<8x8xf32>
    %163 = math.exp %162 : vector<8x8xf32>
    %164 = arith.mulf %160, %146 : vector<8x1xf32>
    %cst_88 = arith.constant dense<0.000000e+00> : vector<8xf32>
    %165 = vector.multi_reduction <add>, %163, %cst_88 [1] : vector<8x8xf32> to vector<8xf32>
    %166 = vector.shape_cast %165 : vector<8xf32> to vector<8x1xf32>
    %167 = arith.addf %164, %166 : vector<8x1xf32>
    %cst_89 = arith.constant dense<0.000000e+00> : vector<8x8xf32>
    %168 = tpu.matmul %163, %154, %cst_89 {dimension_numbers = #tpu.dot_dimension_numbers<[1], [0], [0], [1], [0, 0, 1, 1], [], []>} : vector<8x8xf32>, vector<8x8xf32>, vector<8x8xf32> -> vector<8x8xf32>
    %169 = vector.broadcast %160 : vector<8x1xf32> to vector<8x8xf32>
    %170 = arith.mulf %169, %147 : vector<8x8xf32>
    %171 = arith.addf %170, %168 : vector<8x8xf32>
    %172 = tpu.reciprocal %167 : vector<8x1xf32> -> vector<8x1xf32>
    %173 = vector.broadcast %172 : vector<8x1xf32> to vector<8x8xf32>
    %174 = arith.mulf %171, %173 : vector<8x8xf32>
    %c3_90 = arith.constant 3 : index
    %c0_91 = arith.constant 0 : index
    %c0_92 = arith.constant 0 : index
    %175 = vector.load %arg9[%c3_90, %c0_91, %c0_92] : memref<4x8x32xf32, #tpu.memory_space<vmem>>, vector<1x8x32xf32>
    %176 = vector.shape_cast %175 : vector<1x8x32xf32> to vector<8x32xf32>
    %cst_93 = arith.constant dense<0.000000e+00> : vector<8x32xf32>
    %177 = tpu.matmul %174, %176, %cst_93 {dimension_numbers = #tpu.dot_dimension_numbers<[1], [0], [0], [1], [0, 0, 1, 1], [], []>} : vector<8x8xf32>, vector<8x32xf32>, vector<8x32xf32> -> vector<8x32xf32>
    %178 = arith.addf %135, %177 : vector<8x32xf32>
    %c0_94 = arith.constant 0 : index
    %c0_95 = arith.constant 0 : index
    %179 = vector.load %arg10[%c0_94, %c0_95] : memref<1x32xf32, #tpu.memory_space<vmem>>, vector<1x32xf32>
    %180 = vector.broadcast %179 : vector<1x32xf32> to vector<8x32xf32>
    %181 = arith.addf %178, %180 : vector<8x32xf32>
    %c0_96 = arith.constant 0 : index
    %c0_97 = arith.constant 0 : index
    %c0_98 = arith.constant 0 : index
    %182 = vector.load %arg11[%c0_96, %c0_97, %c0_98] : memref<1x8x32xf32, #tpu.memory_space<vmem>>, vector<1x8x32xf32>
    %183 = vector.shape_cast %182 : vector<1x8x32xf32> to vector<8x32xf32>
    %184 = vector.shape_cast %181 : vector<8x32xf32> to vector<1x8x32xf32>
    tpu.vector_store %arg11[%c0_96, %c0_97, %c0_98], %184 {strides = array<i32>} : memref<1x8x32xf32, #tpu.memory_space<vmem>>, vector<1x8x32xf32>,
    return
  }
  func.func @transform_0(%arg0: i32, %arg1: i32) -> (i32, i32, i32) {
    %c0_i32 = arith.constant 0 : i32
    %c0_i32_0 = arith.constant 0 : i32
    %c0_i32_1 = arith.constant 0 : i32
    return %arg0, %c0_i32, %c0_i32_0 : i32, i32, i32
  }
  func.func @transform_1(%arg0: i32, %arg1: i32) -> (i32, i32, i32) {
    %c0_i32 = arith.constant 0 : i32
    %c0_i32_0 = arith.constant 0 : i32
    %c0_i32_1 = arith.constant 0 : i32
    %c0_i32_2 = arith.constant 0 : i32
    return %c0_i32, %c0_i32_0, %c0_i32_1 : i32, i32, i32
  }
  func.func @transform_2(%arg0: i32, %arg1: i32) -> (i32, i32, i32) {
    %c0_i32 = arith.constant 0 : i32
    %c0_i32_0 = arith.constant 0 : i32
    %c0_i32_1 = arith.constant 0 : i32
    %c0_i32_2 = arith.constant 0 : i32
    return %c0_i32, %c0_i32_0, %c0_i32_1 : i32, i32, i32
  }
  func.func @transform_3(%arg0: i32, %arg1: i32) -> (i32, i32, i32) {
    %c0_i32 = arith.constant 0 : i32
    %c0_i32_0 = arith.constant 0 : i32
    %c0_i32_1 = arith.constant 0 : i32
    %c0_i32_2 = arith.constant 0 : i32
    return %c0_i32, %c0_i32_0, %c0_i32_1 : i32, i32, i32
  }
  func.func @transform_4(%arg0: i32, %arg1: i32) -> (i32, i32, i32) {
    %c0_i32 = arith.constant 0 : i32
    %c0_i32_0 = arith.constant 0 : i32
    %c0_i32_1 = arith.constant 0 : i32
    %c0_i32_2 = arith.constant 0 : i32
    return %c0_i32, %c0_i32_0, %c0_i32_1 : i32, i32, i32
  }
  func.func @transform_5(%arg0: i32, %arg1: i32) -> (i32, i32, i32) {
    %c0_i32 = arith.constant 0 : i32
    %c0_i32_0 = arith.constant 0 : i32
    %c0_i32_1 = arith.constant 0 : i32
    %c0_i32_2 = arith.constant 0 : i32
    return %c0_i32, %c0_i32_0, %c0_i32_1 : i32, i32, i32
  }
  func.func @transform_6(%arg0: i32, %arg1: i32) -> (i32, i32, i32) {
    %c0_i32 = arith.constant 0 : i32
    %c0_i32_0 = arith.constant 0 : i32
    %c0_i32_1 = arith.constant 0 : i32
    %c0_i32_2 = arith.constant 0 : i32
    return %c0_i32, %c0_i32_0, %c0_i32_1 : i32, i32, i32
  }
  func.func @transform_7(%arg0: i32, %arg1: i32) -> (i32, i32, i32) {
    %c0_i32 = arith.constant 0 : i32
    %c0_i32_0 = arith.constant 0 : i32
    %c0_i32_1 = arith.constant 0 : i32
    %c0_i32_2 = arith.constant 0 : i32
    return %c0_i32, %c0_i32_0, %c0_i32_1 : i32, i32, i32
  }
  func.func @transform_8(%arg0: i32, %arg1: i32) -> (i32, i32) {
    %c0_i32 = arith.constant 0 : i32
    %c0_i32_0 = arith.constant 0 : i32
    %c0_i32_1 = arith.constant 0 : i32
    return %c0_i32, %c0_i32_0 : i32, i32
  }
  func.func @transform_9(%arg0: i32, %arg1: i32) -> (i32, i32, i32) {
    %c0_i32 = arith.constant 0 : i32
    %c0_i32_0 = arith.constant 0 : i32
    return %arg0, %arg1, %c0_i32 : i32, i32, i32
  }
}

</mosaic_0001>

<bundles_post_ra>
// kernel: tpu_custom_call.1
= control target key start
LH: loop header
LB: loop body
LE: loop exit
PB: predicated region body
PF: predicated region fallthrough
CT: control target
= control target key end

     0   :  { %s1929_s0 = inlined_call_operand.vmem [shape: f32[2,8,32], index: 0, kind: input, shape index: {}]   ;;  %s1930_s1 = inlined_call_operand.vmem [shape: f32[4,32,8], index: 1, kind: input, shape index: {}]   ;;  %s1931_s2 = inlined_call_operand.vmem [shape: f32[4,1,8], index: 2, kind: input, shape index: {}]   ;;  %s1932_s3 = inlined_call_operand.vmem [shape: f32[4,32,8], index: 3, kind: input, shape index: {}]   ;;  %s1933_s4 = inlined_call_operand.vmem [shape: f32[4,1,8], index: 4, kind: input, shape index: {}]   ;;  %s1934_s5 = inlined_call_operand.vmem [shape: f32[4,32,8], index: 5, kind: input, shape index: {}]   ;;  %s1935_s6 = inlined_call_operand.vmem [shape: f32[4,1,8], index: 6, kind: input, shape index: {}]   ;;  %s1936_s7 = inlined_call_operand.vmem [shape: f32[4,8,32], index: 7, kind: input, shape index: {}]   ;;  %s1937_s8 = inlined_call_operand.vmem [shape: f32[1,32], index: 8, kind: input, shape index: {}]   ;;  %s1938_s9 = inlined_call_operand.hbm [shape: f32[2,8,32], index: 9, kind: output, shape index: {}]  }
   0x1   :  { %1939 = sst [smem:[#allocation7_spill]] %s1929_s0 }
   0x2   :  { %14 = vsyncpa [#allocation5], 0 }
   0x3   :  { %16 = vsyncpa [#allocation5 + $0x1], 0  ;;  %s1574_s30 = smov 0   ;;  %s1576_s10 = smov 0  }
   0x4   :  { %s1578_s11 = smov 0   ;;  %s1580_s12 = smov 0  }
   0x5   :  { %s1582_s13 = smov 0   ;;  %s1584_s14 = smov 0  }
   0x6 LB: > { %s1265_s15 = sadd.s32 4294967295, %s1522_s14   ;;  %s1266_s16 = sadd.s32 4294967294, %s1522_s14   ;;  %s1522_s14 = sphi %s1584_s14, %s22_s14   ;;  %s1518_s13 = sphi %s1582_s13, %s1947_s13   ;;  %s1514_s12 = sphi %s1580_s12, %s1946_s12   ;;  %s1510_s11 = sphi %s1578_s11, %s1945_s11   ;;  %s1506_s10 = sphi %s1576_s10, %s1944_s10   ;;  %s1502_s30 = sphi %s1574_s30, %s1943_s30  }
   0x7   : > { %s34_s17 = sadd.s32 1, %s1518_s13  ;;  %s237_s18 = sadd.s32 1, %s1510_s11 }
   0x8   : > { %p36_p0 = scmp.ge.s32.totalorder %s34_s17, 2  ;;  %p247_p1 = scmp.ne.s32.totalorder %s1510_s11, %s1506_s10 }
   0x9   : > { %p248_p2 = scmp.eq.s32.totalorder %s1265_s15, 1  ;;  %p253_p3 = scmp.ne.s32.totalorder %s1506_s10, %s1502_s30 }
   0xa   : > { %s1949_s17 = smov (%p36_p0, %s34_s17), 0  ;;  %p254_p5 = scmp.eq.s32.totalorder %s1266_s16, 1 }
   0xb   : > { %p1614_p4 = por %p248_p2, %p247_p1  ;;  %s232_s20 = ssub.s32 %s1518_s13, %s1949_s17 }
   0xc   : > { %p1269_p6 = scmp.ge.s32.totalorder %s1522_s14, 1  ;;  %p235_p7 = scmp.eq.s32.totalorder %s232_s20, 0 }
   0xd   : > { %p1621_p8 = por %p254_p5, %p253_p3  ;;  %p303_p9 = scmp.lt.s32.totalorder %s1522_s14, 3 }
   0xe   : > { %s1627_s22 = scalar_select %p235_p7, %s1510_s11, %s237_s18  }
   0xf   : > { %p304_p10 = pnand %p1269_p6, %p303_p9 }
  0x10   : > { %p338_p11 = scmp.lt.s32.totalorder (!%p304_p10), %s1514_s12, 1  ;;  %s1942_s0 = sld [smem:[#allocation7_spill]] (!%p304_p10) }
  0x11   : > { %307 = sbr.rel (%p304_p10) target bundleno = 984 (0x3d8), region = 56  ;;  %s1349_s26 = sshll.u32 (!%p304_p10), %s1514_s12, 3 }
  0x12   : > { %s1184_s15 = scalar_lea.hbm (!%p304_p10), %s1938_s9, %s1349_s26 }
  0x13   : > { %s1188_s23 = sshll.u32 (!%p304_p10), %s1184_s15, 4  ;;  %s1189_s23 = int_to_ptr.hbm [resolvable:$true] %s1188_s23 }
  0x16   : > { %v350_v0 = vld [vmem:[%s1932_s3 + $0x18] sm:$0xff]  ;;  %v349_v2 = vld [vmem:[%s1932_s3 + $0x10] sm:$0xff]  ;;  %v348_v5 = vld [vmem:[%s1932_s3 + $0x8] sm:$0xff]  ;;  %s339_s28 = scalar_select %p338_p11, %s1514_s12, 1  ;;  %vm355_vm0 = vcmask 261120   ;;  %vm379_vm1 = vcmask 64512  }
  0x17   : > { %v1283_v1 = vld [vmem:[%s1934_s5 + $0x38] sm:$0xff]  ;;  %371 = vmatpush.msra.mxu0 %v350_v0  ;;  %v1282_v4 = vld [vmem:[%s1934_s5 + $0x30] sm:$0xff]  ;;  %v1281_v7 = vld [vmem:[%s1934_s5 + $0x28] sm:$0xff] }
  0x18   : > { %464 = vmatpush.msra.mxu3 %v1283_v1  ;;  %v1277_v3 = vld [vmem:[%s1932_s3 + $0x38] sm:$0xff]  ;;  %v1276_v6 = vld [vmem:[%s1932_s3 + $0x30] sm:$0xff]  ;;  %v1275_v8 = vld [vmem:[%s1932_s3 + $0x28] sm:$0xff]  ;;  %s1271_s24 = sshll.u32 %s339_s28, 3 }
  0x19   : > { %432 = vmatpush.msra.mxu2 %v1277_v3  ;;  %372 = vmatpush.msra.mxu0 %v349_v2  ;;  %v347_v9 = vld [vmem:[%s1932_s3] sm:$0xff]  ;;  %s341_s27 = scalar_lea.vmem %s1942_s0, %s1271_s24  ;;  %v1307_v12 = vld [vmem:[%s1934_s5 + $0x78] sm:$0xff]  ;;  %v1306_v15 = vld [vmem:[%s1934_s5 + $0x70] sm:$0xff]  ;;  %s335_s24 = sand.u32 1, %s1506_s10  }
  0x1a   : > { %465 = vmatpush.msra.mxu3 %v1282_v4  ;;  %v1280_v10 = vld [vmem:[%s1934_s5 + $0x20] sm:$0xff]  ;;  %v1289_v14 = vld [vmem:[%s1932_s3 + $0x58] sm:$0xff]  ;;  %v1288_v16 = vld [vmem:[%s1932_s3 + $0x50] sm:$0xff]  ;;  %s1270_s25 = sshll.u32 %s335_s24, 3  ;;  %s1173_s12 = scalar_lea.sflag [#allocation5], %s335_s24 }
  0x1b   : > { %433 = vmatpush.msra.mxu2 %v1276_v6  ;;  %373 = vmatpush.msra.mxu0 %v348_v5  ;;  %v1667_v11 = vld [vmem:[%s341_s27] sm:$0xff]  ;;  %v1305_v17 = vld [vmem:[%s1934_s5 + $0x68] sm:$0xff]  ;;  %v384_v19 = vld [vmem:[%s1934_s5 + $0x18] sm:$0xff]  ;;  %s337_s28 = scalar_lea.vmem [#allocation4], %s1270_s25  ;;  %s1458_s0 = sshra.s32 %s1189_s23, 4  ;;  %s1459_s0 = int_to_ptr.hbm [resolvable:$true] %s1458_s0 }
  0x1c   : > { %466 = vmatpush.msra.mxu3 %v1281_v7  ;;  %v1274_v13 = vld [vmem:[%s1932_s3 + $0x20] sm:$0xff]  ;;  %v1287_v18 = vld [vmem:[%s1932_s3 + $0x48] sm:$0xff]  ;;  %401 = vmatpush.msra.mxu1 %v384_v19  ;;  %v1317_v22 = vld [vmem:[%s1930_s1 + $0x38] sm:$0xff]  ;;  %s1186_s20 = sshll.u32 %s337_s28, 4  ;;  %s1460_s26 = scalar_lea.hbm %s1459_s0, 8  ;;  %s1187_s20 = int_to_ptr.vmem [resolvable:$true] %s1186_s20 }
  0x1d   : > { %434 = vmatpush.msra.mxu2 %v1275_v8  ;;  %374 = vmatpush.msra.mxu0 %v347_v9  ;;  %v1304_v20 = vld [vmem:[%s1934_s5 + $0x60] sm:$0xff]  ;;  %v608_v23 = vld [vmem:[%s1930_s1 + $0x18] sm:$0xff]  ;;  %v1316_v24 = vld [vmem:[%s1930_s1 + $0x30] sm:$0xff]  ;;  %p1461_p12 = scmp.ne.s32.totalorder %s1459_s0, %s1460_s26  ;;  %s1464_s25 = scalar_lea.hbm %s1938_s9, 16 }
  0x1e   : > { %467 = vmatpush.msra.mxu3 %v1280_v10  ;;  %1272 = vmatmul.msk.f32.vlgmr.msra.gmra.mxu0 %vm355_vm0, %v1667_v11  ;;  %v1286_v21 = vld [vmem:[%s1932_s3 + $0x40] sm:$0xff]  ;;  %v607_v25 = vld [vmem:[%s1930_s1 + $0x10] sm:$0xff]  ;;  %v1315_v26 = vld [vmem:[%s1930_s1 + $0x28] sm:$0xff]  ;;  %p1465_p1 = scmp.lt.s32.totalorder %s1459_s0, %s1938_s9  ;;  %p1466_p2 = scmp.lt.s32.totalorder %s1464_s25, %s1460_s26 }
  0x1f   : > { %1285 = vmatmul.msk.f32.vlgmr.msra.gmra.mxu3 %vm355_vm0, %v1667_v11  ;;  %435 = vmatpush.msra.mxu2 %v1274_v13  ;;  %v606_v27 = vld [vmem:[%s1930_s1 + $0x8] sm:$0xff]  ;;  %v1314_v28 = vld [vmem:[%s1930_s1 + $0x20] sm:$0xff]  ;;  %v383_v30 = vld [vmem:[%s1934_s5 + $0x10] sm:$0xff]  ;;  %p1462_p13 = pnand %p1461_p12, %p1614_p4 }
  0x20   : > { %592 = vmatpush.msrb.mxu3 %v1307_v12  ;;  %496 = vmatpush.msrb.mxu0 %v1289_v14  ;;  %v605_v29 = vld [vmem:[%s1930_s1] sm:$0xff]  ;;  %v382_v31 = vld [vmem:[%s1934_s5 + $0x8] sm:$0xff]  ;;  %v1295_v33 = vld [vmem:[%s1934_s5 + $0x58] sm:$0xff]  ;;  %p1467_p3 = por %p1466_p2, %p1465_p1 }
  0x21   : > { %1279 = vmatmul.msk.f32.vlgmr.msra.gmra.mxu2 %vm355_vm0, %v1667_v11  ;;  %402 = vmatpush.msra.mxu1 %v383_v30  ;;  %v381_v32 = vld [vmem:[%s1934_s5] sm:$0xff]  ;;  %v1294_v34 = vld [vmem:[%s1934_s5 + $0x50] sm:$0xff]  ;;  %v1293_v35 = vld [vmem:[%s1934_s5 + $0x48] sm:$0xff]  ;;  %p1463_p0 = pneg %p1462_p13 }
  0x22   : > { %593 = vmatpush.msrb.mxu3 %v1306_v15  ;;  %497 = vmatpush.msrb.mxu0 %v1288_v16  ;;  %v1292_v36 = vld [vmem:[%s1934_s5 + $0x40] sm:$0xff]  ;;  %v1301_v63 = vld [vmem:[%s1932_s3 + $0x78] sm:$0xff]  ;;  %v1300_v0 = vld [vmem:[%s1932_s3 + $0x70] sm:$0xff] }
  0x23   : > { %403 = vmatpush.msra.mxu1 %v382_v31  ;;  %v1407_v37 = vld [vmem:[%s1933_s4] ss:$0 sm:$0xff]  ;;  %v1408_v40 = vld [vmem:[%s1935_s6 + $0x1] ss:$0 sm:$0xff]  ;;  %v1410_v43 = vld [vmem:[%s1933_s4 + $0x2] ss:$0 sm:$0xff]  ;;  %560 = vmatpush.msrb.mxu2 %v1301_v63  ;;  %p1468_p5 = pnand %p1467_p3, %p1463_p0 }
  0x24   : > { %594 = vmatpush.msrb.mxu3 %v1305_v17  ;;  %498 = vmatpush.msrb.mxu0 %v1287_v18  ;;  %v1409_v41 = vld [vmem:[%s1933_s4 + $0x1] ss:$0 sm:$0xff]  ;;  %v1411_v50 = vld [vmem:[%s1935_s6 + $0x3] ss:$0 sm:$0xff]  ;;  %v1412_v52 = vld [vmem:[%s1931_s2] ss:$0 sm:$0xff] }
  0x25   : > { %404 = vmatpush.msra.mxu1 %v381_v32  ;;  %v1413_v58 = vld [vmem:[%s1931_s2 + $0x1] ss:$0 sm:$0xff]  ;;  %v1299_v1 = vld [vmem:[%s1932_s3 + $0x68] sm:$0xff]  ;;  %561 = vmatpush.msrb.mxu2 %v1300_v0  ;;  %v1414_v3 = vld [vmem:[%s1935_s6] ss:$0 sm:$0xff] }
  0x26   : > { %595 = vmatpush.msrb.mxu3 %v1304_v20  ;;  %499 = vmatpush.msrb.mxu0 %v1286_v21  ;;  %v1298_v2 = vld [vmem:[%s1932_s3 + $0x60] sm:$0xff]  ;;  %v1329_v10 = vld [vmem:[%s1930_s1 + $0x58] sm:$0xff]  ;;  %v1328_v12 = vld [vmem:[%s1930_s1 + $0x50] sm:$0xff] }
  0x27   : > { %1309 = vmatmul.msk.f32.vlgmr.msrb.gmra.mxu3 %vm355_vm0, %v1667_v11  ;;  %1291 = vmatmul.msk.f32.vlgmr.msrb.gmra.mxu0 %vm355_vm0, %v1667_v11  ;;  %v1415_v6 = vld [vmem:[%s1935_s6 + $0x2] ss:$0 sm:$0xff]  ;;  %v1327_v13 = vld [vmem:[%s1930_s1 + $0x48] sm:$0xff]  ;;  %v1340_v15 = vld [vmem:[%s1930_s1 + $0x78] sm:$0xff] }
  0x28   : > { %743 = vmatpush.msra.mxu3 %v1317_v22  ;;  %629 = vmatpush.msra.mxu0 %v608_v23  ;;  %v1326_v14 = vld [vmem:[%s1930_s1 + $0x40] sm:$0xff]  ;;  %v1339_v16 = vld [vmem:[%s1930_s1 + $0x70] sm:$0xff]  ;;  %v1338_v17 = vld [vmem:[%s1930_s1 + $0x68] sm:$0xff] }
  0x29   : > { %1273 = vmatmul.msk.f32.vlgmr.msra.gmra.mxu1 %vm355_vm0, %v1667_v11  ;;  %562 = vmatpush.msrb.mxu2 %v1299_v1  ;;  %v1337_v18 = vld [vmem:[%s1930_s1 + $0x60] sm:$0xff] }
  0x2a   : > { %744 = vmatpush.msra.mxu3 %v1316_v24  ;;  %630 = vmatpush.msra.mxu0 %v607_v25  ;;  %v1416_v24 = vld [vmem:[%s1933_s4 + $0x3] ss:$0 sm:$0xff] }
  0x2b   : > { %528 = vmatpush.msrb.mxu1 %v1295_v33  ;;  %563 = vmatpush.msrb.mxu2 %v1298_v2 }
  0x2c   : > { %745 = vmatpush.msra.mxu3 %v1315_v26  ;;  %631 = vmatpush.msra.mxu0 %v606_v27 }
  0x2d   : > { %529 = vmatpush.msrb.mxu1 %v1294_v34  ;;  %1303 = vmatmul.msk.f32.vlgmr.msrb.gmra.mxu2 %vm355_vm0, %v1667_v11  ;;  %v1417_v34 = vld [vmem:[%s1931_s2 + $0x2] ss:$0 sm:$0xff] }
  0x2e   : > { %746 = vmatpush.msra.mxu3 %v1314_v28  ;;  %632 = vmatpush.msra.mxu0 %v605_v29 }
  0x2f   : > { %1319 = vmatmul.msk.f32.vlgmr.msra.gmra.mxu3 %vm355_vm0, %v1667_v11  ;;  %1310 = vmatmul.msk.f32.vlgmr.msra.gmra.mxu0 %vm355_vm0, %v1667_v11 }
  0x30   : > { %530 = vmatpush.msrb.mxu1 %v1293_v35 }
  0x32   : > { %531 = vmatpush.msrb.mxu1 %v1292_v36 }
  0x33   : > { %1297 = vmatmul.msk.f32.vlgmr.msrb.gmra.mxu1 %vm355_vm0, %v1667_v11 }
  0x9b   : > { %v376_v38 = vpop.f32.mrf.mxu0 }
  0x9c   : > { %v377_v39 = vadd.f32 %v1407_v37, %v376_v38 }
  0x9e   : > { %380 = vst.msk [vmem:[#allocation2] sm:$0xff] %vm379_vm1, %v377_v39 }
  0xa2   : > { %v469_v42 = vpop.f32.mrf.mxu3 }
  0xa3   : > { %v470_v44 = vadd.f32 %v1408_v40, %v469_v42  ;;  %v1418_v40 = vld [vmem:[%s1931_s2 + $0x3] ss:$0 sm:$0xff] }
  0xa4   : > { %v437_v45 = vpop.f32.mrf.mxu2  ;;  %v501_v47 = vpop.f32.mrf.mxu0 }
  0xa5   : > { %473 = vst.msk [vmem:[#allocation3 + $0x8] sm:$0xff] %vm379_vm1, %v470_v44  ;;  %v438_v46 = vadd.f32 %v1409_v41, %v437_v45  ;;  %v502_v48 = vadd.f32 %v1410_v43, %v501_v47  ;;  %v638_v49 = vld [vmem:[#allocation2] sm:$0xff]  ;;  %v1323_v44 = vld [vmem:[%s1936_s7 + $0x8] sm:$0xff] }
  0xa6   : > { %1311 = vmatpush.xpose.msk.msra.mxu1 %vm379_vm1, %v638_v49  ;;  %v406_v4 = vpop.f32.mrf.mxu1 }
  0xa7   : > { %441 = vst.msk [vmem:[#allocation2 + $0x8] sm:$0xff] %vm379_vm1, %v438_v46  ;;  %v407_v5 = vadd.f32 %v1414_v3, %v406_v4 }
  0xa8   : > { %505 = vst.msk [vmem:[#allocation2 + $0x10] sm:$0xff] %vm379_vm1, %v502_v48 }
  0xa9   : > { %409 = vst.msk [vmem:[#allocation3] sm:$0xff] %vm379_vm1, %v407_v5 }
  0xaa   : > { %v597_v51 = vpop.f32.mrf.mxu3 }
  0xab   : > { %v598_v53 = vadd.f32 %v1411_v50, %v597_v51 }
  0xac   : > { %v756_v54 = vld [vmem:[#allocation3 + $0x8] sm:$0xff]  ;;  %v634_v55 = vpop.f32.mrf.mxu0 }
  0xad   : > { %601 = vst.msk [vmem:[#allocation3 + $0x18] sm:$0xff] %vm379_vm1, %v598_v53  ;;  %815 = vmatpush.msrb.mxu1 %v756_v54  ;;  %v635_v56 = vadd.f32 %v1412_v52, %v634_v55 }
  0xae   : > { %v754_v57 = vld [vmem:[#allocation2 + $0x8] sm:$0xff] }
  0xaf   : > { %1320 = vmatpush.xpose.msk.msrb.mxu0 %vm379_vm1, %v754_v57  ;;  %v637_v59 = vmul.f32 0.35355338, %v635_v56  ;;  %v917_v9 = vld [vmem:[#allocation2 + $0x10] sm:$0xff] }
  0xb0   : > { %v533_v7 = vpop.f32.mrf.mxu1  ;;  %v639_v23 = vld [vmem:[#allocation3] sm:$0xff]  ;;  %v565_v25 = vpop.f32.mrf.mxu2 }
  0xb1   : > { %1312 = vmatmul.msk.f32.vlgmr.msra.gmra.mxu1 %vm379_vm1, %v637_v59  ;;  %v534_v8 = vadd.f32 %v1415_v6, %v533_v7  ;;  %699 = vmatpush.msra.mxu2 %v639_v23  ;;  %v566_v26 = vadd.f32 %v1416_v24, %v565_v25 }
  0xb2   : > { %v748_v60 = vpop.f32.mrf.mxu3  ;;  %1332 = vmatpush.xpose.msk.msra.mxu1 %vm379_vm1, %v917_v9  ;;  %v720_v9 = vld [vmem:[%s1936_s7] sm:$0xff] }
  0xb3   : > { %v749_v61 = vadd.f32 %v1413_v58, %v748_v60  ;;  %537 = vst.msk [vmem:[#allocation3 + $0x10] sm:$0xff] %vm379_vm1, %v534_v8  ;;  %906 = vmatpush.msra.mxu0 %v1329_v10  ;;  %856 = vmatpush.msrb.mxu2 %v1323_v44 }
  0xb4   : > { %569 = vst.msk [vmem:[#allocation2 + $0x18] sm:$0xff] %vm379_vm1, %v566_v26  ;;  %v1060_v3 = vld [vmem:[#allocation3 + $0x18] sm:$0xff]  ;;  %879 = vmatpush.msrb.mxu3 %v720_v9 }
  0xb5   : > { %v751_v62 = vmul.f32 0.35355338, %v749_v61  ;;  %907 = vmatpush.msra.mxu0 %v1328_v12 }
  0xb7   : > { %1321 = vmatmul.msk.f32.vlgmr.msrb.gmra.mxu0 %vm379_vm1, %v751_v62 }
  0xb8   : > { %908 = vmatpush.msra.mxu0 %v1327_v13 }
  0xba   : > { %909 = vmatpush.msra.mxu0 %v1326_v14  ;;  %v919_v45 = vld [vmem:[#allocation3 + $0x10] sm:$0xff] }
  0xbb   : > { %v1058_v35 = vld [vmem:[#allocation2 + $0x18] sm:$0xff] }
  0xbc   : > { %1047 = vmatpush.msrb.mxu0 %v1340_v15 }
  0xbe   : > { %1048 = vmatpush.msrb.mxu0 %v1339_v16 }
  0xbf   : > { %1331 = vmatmul.msk.f32.vlgmr.msra.gmra.mxu0 %vm355_vm0, %v1667_v11 }
  0xc0   : > { %1049 = vmatpush.msrb.mxu0 %v1338_v17 }
  0xc2   : > { %1050 = vmatpush.msrb.mxu0 %v1337_v18 }
  0xc7   : > { %1342 = vmatmul.msk.f32.vlgmr.msrb.gmra.mxu0 %vm355_vm0, %v1667_v11 }
 0x12e   : > { %v664_v19 = vpop.f32.mrf.mxu1 }
 0x12f   : > { %v667_v20 = vsel %vm379_vm1, %v664_v19, -inf }
 0x130   : > { %668 = vmax.xlane.f32.xlu1 %v667_v20 }
 0x134   : > { %v780_v21 = vpop.f32.mrf.mxu0 }
 0x135   : > { %v783_v22 = vsel %vm379_vm1, %v780_v21, -inf }
 0x136   : > { %784 = vmax.xlane.f32.xlu0 %v783_v22 }
 0x13c   : > { %v911_v33 = vpop.f32.mrf.mxu0 }
 0x13d   : > { %v912_v38 = vadd.f32 %v1417_v34, %v911_v33 }
 0x13f   : > { %v914_v39 = vmul.f32 0.35355338, %v912_v38 }
 0x144   : > { %v1052_v41 = vpop.f32.mrf.mxu0 }
 0x145   : > { %v1053_v42 = vadd.f32 %v1418_v40, %v1052_v41  ;;  %v1346_v41 = vld [vmem:[%s1936_s7 + $0x18] sm:$0xff] }
 0x147   : > { %v1055_v43 = vmul.f32 0.35355338, %v1053_v42 }
 0x1a3   : > { %v1849_v27 = vpop.xlane.xlu1 %668 }
 0x1a4   : > { %v673_v11 = vsub.f32 %v664_v19, %v1849_v27  ;;  %v670_v7 = vsub.f32 -inf, %v1849_v27 }
 0x1a6   : > { %v674_v28 = vmul.f32 1.442695, %v673_v11  ;;  %v671_v10 = vmul.f32 1.442695, %v670_v7 }
 0x1a8   : > { %1420 = vpow2.f32 %v674_v28 }
 0x1a9   : > { %v785_v29 = vpop.xlane.xlu0 %784 }
 0x1aa   : > { %v789_v30 = vsub.f32 %v780_v21, %v785_v29  ;;  %v786_v46 = vsub.f32 -inf, %v785_v29 }
 0x1ac   : > { %v790_v31 = vmul.f32 1.442695, %v789_v30  ;;  %v787_v47 = vmul.f32 1.442695, %v786_v46 }
 0x1ae   : > { %1422 = vpow2.f32 %v790_v31  ;;  %v1421_v32 = vpop.eup %1420 }
 0x1af   : > { %1313 = vmatmul.msk.f32.vlgmr.msra.gmra.mxu2 %vm379_vm1, %v1421_v32  ;;  %1424 = vpow2.f32 %v787_v47  ;;  %v677_v6 = vsel %vm379_vm1, %v1421_v32, 0.0 }
 0x1b0   : > { %978 = vmatpush.msra.mxu2 %v919_v45 }
 0x1b4   : > { %v1423_v36 = vpop.eup %1422 }
 0x1b5   : > { %1322 = vmatmul.msk.f32.vlgmr.msrb.gmra.mxu1 %vm379_vm1, %v1423_v36  ;;  %v793_v37 = vsel %vm379_vm1, %v1423_v36, 0.0  ;;  %v1425_v48 = vpop.eup %1424 }
 0x1b6   : > { %794 = vadd.xlane.f32.xlu0 %v793_v37  ;;  %1343 = vmatpush.xpose.msk.msrb.mxu1 %vm379_vm1, %v1058_v35  ;;  %v792_v49 = vmul.f32 0.0, %v1425_v48 }
 0x1bd   : > { %1333 = vmatmul.msk.f32.vlgmr.msra.gmra.mxu1 %vm379_vm1, %v914_v39  ;;  %v1335_v39 = vld [vmem:[%s1936_s7 + $0x10] sm:$0xff] }
 0x1be   : > { %1019 = vmatpush.msra.mxu3 %v1335_v39 }
 0x1c5   : > { %1344 = vmatmul.msk.f32.vlgmr.msrb.gmra.mxu1 %vm379_vm1, %v1055_v43 }
 0x229   : > { %v795_v50 = vpop.xlane.xlu0 %794 }
 0x22a   : > { %v796_v51 = vadd.f32 %v795_v50, %v792_v49 }
 0x22c   : > { %1426 = vrcp.f32 %v796_v51  ;;  %v832_v56 = vand.u32 2147483648, %v796_v51  ;;  %v830_v58 = vand.u32 2147483647, %v796_v51  ;;  %vm826_vm3 = vweird.f32 %v796_v51 }
 0x22d   : > { %1428 = vpow2.f32 %v671_v10 }
 0x22e   : > { %v833_v60 = vor.u32 1.1754944e-38, %v832_v56  ;;  %vm831_vm5 = vcmp.eq.f32.partialorder %v830_v58, 8.507059e+37 }
 0x232   : > { %v1427_v52 = vpop.eup %1426  ;;  %v817_v53 = vpop.f32.mrf.mxu1 }
 0x233   : > { %v822_v54 = vmul.f32 %v1427_v52, %v796_v51  ;;  %vm827_vm2 = vweird.f32 %v1427_v52  ;;  %v820_v62 = vadd.f32 %v817_v53, %v792_v49  ;;  %v1429_v16 = vpop.eup %1428  ;;  %v701_v30 = vpop.f32.mrf.mxu2 }
 0x234   : > { %vm828_vm4 = vmor %vm826_vm3, %vm827_vm2  ;;  %v676_v20 = vmul.f32 0.0, %v1429_v16 }
 0x235   : > { %v823_v55 = vsub.f32 1.0, %v822_v54 }
 0x236   : > { %v704_v33 = vadd.f32 %v701_v30, %v676_v20 }
 0x237   : > { %v824_v57 = vmul.f32 %v1427_v52, %v823_v55 }
 0x239   : > { %v825_v59 = vadd.f32 %v1427_v52, %v824_v57 }
 0x23a   : > { %v943_v61 = vpop.f32.mrf.mxu1 }
 0x23b   : > { %v829_v63 = vsel %vm828_vm4, %v1427_v52, %v825_v59  ;;  %v946_v0 = vsel %vm379_vm1, %v943_v61, -inf }
 0x23c   : > { %v834_v1 = vsel %vm831_vm5, %v833_v60, %v829_v63  ;;  %947 = vmax.xlane.f32.xlu1 %v946_v0 }
 0x23d   : > { %v835_v2 = vmul.f32 %v834_v1, %v820_v62 }
 0x23f   : > { %1324 = vmatmul.msk.f32.vlgmr.msrb.gmra.mxu2 %vm379_vm1, %v835_v2 }
 0x240   : > { %1119 = vmatpush.msrb.mxu2 %v1060_v3 }
 0x242   : > { %v1084_v4 = vpop.f32.mrf.mxu1 }
 0x243   : > { %v1087_v5 = vsel %vm379_vm1, %v1084_v4, -inf }
 0x244   : > { %1088 = vmax.xlane.f32.xlu2 %v1087_v5 }
 0x24c   : > { %678 = vadd.xlane.f32.xlu2 %v677_v6 }
 0x2af   : > { %v948_v8 = vpop.xlane.xlu1 %947 }
 0x2b0   : > { %v952_v12 = vsub.f32 %v943_v61, %v948_v8  ;;  %v949_v37 = vsub.f32 -inf, %v948_v8 }
 0x2b2   : > { %v953_v13 = vmul.f32 1.442695, %v952_v12  ;;  %v950_v38 = vmul.f32 1.442695, %v949_v37 }
 0x2b4   : > { %1430 = vpow2.f32 %v953_v13 }
 0x2b7   : > { %v1089_v14 = vpop.xlane.xlu2 %1088 }
 0x2b8   : > { %v1093_v15 = vsub.f32 %v1084_v4, %v1089_v14  ;;  %v1090_v40 = vsub.f32 -inf, %v1089_v14 }
 0x2ba   : > { %v1094_v17 = vmul.f32 1.442695, %v1093_v15  ;;  %v1431_v18 = vpop.eup %1430  ;;  %v1091_v42 = vmul.f32 1.442695, %v1090_v40 }
 0x2bb   : > { %1334 = vmatmul.msk.f32.vlgmr.msra.gmra.mxu2 %vm379_vm1, %v1431_v18  ;;  %v956_v19 = vsel %vm379_vm1, %v1431_v18, 0.0 }
 0x2bc   : > { %1432 = vpow2.f32 %v1094_v17  ;;  %957 = vadd.xlane.f32.xlu0 %v956_v19  ;;  %v1419_v19 = vld [vmem:[%s1937_s8] ss:$0 sm:$0xff] }
 0x2bf   : > { %v679_v21 = vpop.xlane.xlu2 %678 }
 0x2c0   : > { %v680_v22 = vadd.f32 %v679_v21, %v676_v20 }
 0x2c2   : > { %1434 = vrcp.f32 %v680_v22  ;;  %v1433_v23 = vpop.eup %1432  ;;  %v716_v11 = vand.u32 2147483648, %v680_v22  ;;  %v714_v29 = vand.u32 2147483647, %v680_v22  ;;  %vm710_vm7 = vweird.f32 %v680_v22  ;;  %v858_v48 = vpop.f32.mrf.mxu2 }
 0x2c3   : > { %1345 = vmatmul.msk.f32.vlgmr.msrb.gmra.mxu2 %vm379_vm1, %v1433_v23  ;;  %v1097_v24 = vsel %vm379_vm1, %v1433_v23, 0.0  ;;  %1436 = vpow2.f32 %v950_v38 }
 0x2c4   : > { %1098 = vadd.xlane.f32.xlu1 %v1097_v24  ;;  %v717_v32 = vor.u32 1.1754944e-38, %v716_v11  ;;  %vm715_vm9 = vcmp.eq.f32.partialorder %v714_v29, 8.507059e+37  ;;  %1438 = vpow2.f32 %v1091_v42 }
 0x2c8   : > { %v1435_v25 = vpop.eup %1434 }
 0x2c9   : > { %v706_v26 = vmul.f32 %v1435_v25, %v680_v22  ;;  %vm711_vm6 = vweird.f32 %v1435_v25  ;;  %v1437_v43 = vpop.eup %1436 }
 0x2ca   : > { %vm712_vm8 = vmor %vm710_vm7, %vm711_vm6  ;;  %v955_v44 = vmul.f32 0.0, %v1437_v43  ;;  %v1439_v47 = vpop.eup %1438 }
 0x2cb   : > { %v707_v27 = vsub.f32 1.0, %v706_v26  ;;  %v1096_v49 = vmul.f32 0.0, %v1439_v47 }
 0x2cd   : > { %v708_v28 = vmul.f32 %v1435_v25, %v707_v27 }
 0x2cf   : > { %v709_v31 = vadd.f32 %v1435_v25, %v708_v28 }
 0x2d1   : > { %v713_v34 = vsel %vm712_vm8, %v1435_v25, %v709_v31 }
 0x2d2   : > { %v718_v35 = vsel %vm715_vm9, %v717_v32, %v713_v34 }
 0x2d3   : > { %v719_v36 = vmul.f32 %v718_v35, %v704_v33 }
 0x2d5   : > { %1325 = vmatmul.msk.f32.vlgmr.msrb.gmra.mxu3 %vm379_vm1, %v719_v36 }
 0x2d6   : > { %1160 = vmatpush.msrb.mxu3 %v1346_v41 }
 0x32f   : > { %v958_v45 = vpop.xlane.xlu0 %957 }
 0x330   : > { %v959_v46 = vadd.f32 %v958_v45, %v955_v44 }
 0x332   : > { %1440 = vrcp.f32 %v959_v46  ;;  %v995_v55 = vand.u32 2147483648, %v959_v46  ;;  %v993_v57 = vand.u32 2147483647, %v959_v46  ;;  %vm989_vm11 = vweird.f32 %v959_v46 }
 0x334   : > { %v996_v61 = vor.u32 1.1754944e-38, %v995_v55  ;;  %vm994_vm13 = vcmp.eq.f32.partialorder %v993_v57, 8.507059e+37 }
 0x337   : > { %v1099_v50 = vpop.xlane.xlu1 %1098 }
 0x338   : > { %v1441_v51 = vpop.eup %1440  ;;  %v1100_v52 = vadd.f32 %v1099_v50, %v1096_v49 }
 0x339   : > { %v985_v53 = vmul.f32 %v1441_v51, %v959_v46  ;;  %vm990_vm10 = vweird.f32 %v1441_v51 }
 0x33a   : > { %1442 = vrcp.f32 %v1100_v52  ;;  %vm991_vm12 = vmor %vm989_vm11, %vm990_vm10  ;;  %v1136_v4 = vand.u32 2147483648, %v1100_v52  ;;  %v1134_v6 = vand.u32 2147483647, %v1100_v52  ;;  %vm1130_vm15 = vweird.f32 %v1100_v52 }
 0x33b   : > { %v986_v54 = vsub.f32 1.0, %v985_v53 }
 0x33c   : > { %v1137_v9 = vor.u32 1.1754944e-38, %v1136_v4  ;;  %vm1135_vm3 = vcmp.eq.f32.partialorder %v1134_v6, 8.507059e+37 }
 0x33d   : > { %v987_v56 = vmul.f32 %v1441_v51, %v986_v54 }
 0x33e   : > { %v980_v58 = vpop.f32.mrf.mxu2 }
 0x33f   : > { %v988_v59 = vadd.f32 %v1441_v51, %v987_v56  ;;  %v983_v63 = vadd.f32 %v980_v58, %v955_v44 }
 0x340   : > { %v1443_v60 = vpop.eup %1442 }
 0x341   : > { %v1126_v62 = vmul.f32 %v1443_v60, %v1100_v52  ;;  %v992_v0 = vsel %vm991_vm12, %v1441_v51, %v988_v59  ;;  %vm1131_vm14 = vweird.f32 %v1443_v60 }
 0x342   : > { %v997_v1 = vsel %vm994_vm13, %v996_v61, %v992_v0  ;;  %vm1132_vm2 = vmor %vm1130_vm15, %vm1131_vm14 }
 0x343   : > { %v1127_v2 = vsub.f32 1.0, %v1126_v62  ;;  %v998_v3 = vmul.f32 %v997_v1, %v983_v63 }
 0x345   : > { %1336 = vmatmul.msk.f32.vlgmr.msra.gmra.mxu3 %vm379_vm1, %v998_v3  ;;  %v1128_v5 = vmul.f32 %v1443_v60, %v1127_v2 }
 0x346   : > { %v1121_v7 = vpop.f32.mrf.mxu2 }
 0x347   : > { %v1129_v8 = vadd.f32 %v1443_v60, %v1128_v5  ;;  %v1124_v10 = vadd.f32 %v1121_v7, %v1096_v49 }
 0x349   : > { %v1133_v12 = vsel %vm1132_vm2, %v1443_v60, %v1129_v8 }
 0x34a   : > { %v1138_v13 = vsel %vm1135_vm3, %v1137_v9, %v1133_v12 }
 0x34b   : > { %v1139_v14 = vmul.f32 %v1138_v13, %v1124_v10 }
 0x34d   : > { %1347 = vmatmul.msk.f32.vlgmr.msrb.gmra.mxu3 %vm379_vm1, %v1139_v14 }
 0x358   : > { %v881_v15 = vpop.f32.mrf.mxu3 }
 0x359   : > { %v882_v17 = vadd.f32 %v881_v15, %v858_v48 }
 0x3c8   : > { %v1021_v16 = vpop.f32.mrf.mxu3 }
 0x3c9   : > { %v1024_v18 = vadd.f32 %v1021_v16, %v882_v17 }
 0x3d0   : > { %v1162_v20 = vpop.f32.mrf.mxu3 }
 0x3d1   : > { %v1165_v21 = vadd.f32 %v1162_v20, %v1024_v18 }
 0x3d3   : > { %v1170_v22 = vadd.f32 %v1419_v19, %v1165_v21 }
 0x3d5   : > { %1171 = vst.msk [vmem:[%s337_s28] sm:$0xff] %vm355_vm0, %v1170_v22 }
 0x3d6   : > { %1471 = shalt.err (!%p1468_p5)
}
 0x3d7   : > { %1352 = dma.vmem_to_hbm [thread:$0]  (%p1614_p4), %s1187_s20, 128, %s1189_s23, %s1173_s12  }
 0x3d8 PF: > { %p1358_p6 = scmp.ge.s32.totalorder %s1522_s14, 2  ;;  %s1200_s24 = sand.u32 1, %s1502_s30  }
 0x3d9   : > { %s1201_s18 = scalar_lea.sflag [#allocation5], %s1200_s24 }
 0x3da   : > { %p1355_p7 = pnand %p1358_p6, %p1621_p8 }
 0x3dc   : > { %p1356_p9 = pneg %p1355_p7 }
 0x3de   : > { %1497 = dma.done.wait (%p1356_p9), %s1201_s18, 128  }
 0x3df   : > { %1499 = vsyncadd (%p1356_p9), %s1201_s18, 4294967168  ;;  %s22_s14 = sadd.s32 1, %s1522_s14   ;;  %s1943_s30 = smov %s1506_s10 }
 0x3e0   : > { %p19_p10 = scmp.ge.s32.totalorder %s22_s14, 4   ;;  %s1944_s10 = smov %s1510_s11 }
 0x3e1   : > { %s1945_s11 = smov %s1627_s22  ;;  %s1946_s12 = smov %s1518_s13 }
 0x3e2   : > { %s1947_s13 = smov %s1949_s17  ;;  %21 = sbr.rel (!%p19_p10) target bundleno = 6 (0x6), region = 129 }
 0x3e7   :  { %1207 = vsyncpa [#allocation5], 1 }
 0x3e8   :  { %1209 = vsyncpa [#allocation5 + $0x1], 1 }

</bundles_post_ra>
